<compile_context>
chip_gen: v7x
topology: tpu7x:2x2x1
jax: 0.10.0
libtpu: 0.0.40
codegen_flags: <defaults>
</compile_context>

<pallas_src>
import jax
import jax.numpy as jnp
from jax.experimental import pallas as pl
from jax.experimental.pallas import tpu as pltpu


def _sentence_encoder_kernel(x_ref, adj_ref, w_ref, b_ref, o_ref):
    # x_ref:   (Bb, Np, Dp)  word features in compute dtype (zero-padded in N and D)
    # adj_ref: (Bb, Np, Np)  node-masked adjacency (compute dtype)
    # w_ref:   (L, Dp, Dp)   stacked GCN weights (compute dtype, constant block)
    # b_ref:   (L, 1, Dp)    stacked GCN biases (f32, constant block)
    # o_ref:   (Bb, Np, Dp)  output features
    Bb, Np, Dp = x_ref.shape
    L = w_ref.shape[0]
    cd = x_ref.dtype                         # MXU compute dtype (bf16 or f32)

    # Running features kept in f32 for the residual chain, flattened over (batch, node).
    # Np is a multiple of 8 and Dp of 128, so this reshape is layout-preserving.
    x = x_ref[...].astype(jnp.float32).reshape(Bb * Np, Dp)

    # Small-N graphs: the batched adj@support matmul has M=K=Np and badly underfills
    # the MXU, so do the contraction on the VPU as a broadcast-MAC over m instead.
    use_vpu_adj = Np <= 32
    if use_vpu_adj:
        adj = adj_ref[...].astype(jnp.float32)   # (Bb, Np, Np) f32 for the VPU MACs
    else:
        adj = adj_ref[...]                       # keep compute dtype for the MXU

    for l in range(L):                       # static unroll over GCN layers (L is small)
        w = w_ref[l]                         # (Dp, Dp) compute dtype
        b = b_ref[l]                         # (1, Dp)  f32
        # Fold batch into M so the MXU sees one big (Bb*Np, Dp) x (Dp, Dp) matmul.
        support = jnp.dot(x.astype(cd), w,
                          preferred_element_type=jnp.float32) + b        # (Bb*Np, Dp) f32
        support = support.reshape(Bb, Np, Dp)

        if use_vpu_adj:
            # out[b,n,:] = sum_m adj[b,n,m] * support[b,m,:]  (VPU broadcast-MAC)
            out = adj[:, :, 0:1] * support[:, 0:1, :]
            for m in range(1, Np):
                out = out + adj[:, :, m:m + 1] * support[:, m:m + 1, :]
        else:
            # TODO(synk): for mid-size Np consider the transposed form
            # (support^T @ adj^T) so each MXU matmul streams M=Dp rows.
            out = jnp.einsum("bnm,bmd->bnd", adj, support.astype(cd),
                             preferred_element_type=jnp.float32)          # (Bb, Np, Dp)

        # relu + residual in f32 (node mask already folded into adj rows in wrapper).
        x = x + jnp.maximum(out, 0.0).reshape(Bb * Np, Dp)

    o_ref[...] = x.reshape(Bb, Np, Dp).astype(o_ref.dtype)


def _round_up(v, m):
    return ((v + m - 1) // m) * m


def sentence_encoder_forward(x, mask, node_pos, node_mask, adj_mat, gcn_w, gcn_b,
                             *, compute_dtype=jnp.bfloat16):
    """JAX/Pallas equivalent of SentenceEncoder.forward (inference mode)."""
    B, N, D = x.shape
    L = gcn_w.shape[0]
    out_dtype = x.dtype

    # Computed (and unused, as in the PyTorch forward) — kept for fidelity.
    length = mask.sum(axis=-1)  # noqa: F841
    del node_pos  # unused by the forward pass

    # --- lane/sublane-dense padding (zero padding keeps the math exact) -----------
    Dp = _round_up(max(D, 1), 128)          # lane-dense last dim
    Np = _round_up(max(N, 1), 8)            # sublane-aligned node dim

    # Fold node_mask into the adjacency rows: relu(nm*z) == nm*relu(z) for nm >= 0,
    # so masking adj rows is mathematically identical to masking the GCN output.
    adj_masked = adj_mat.astype(jnp.float32) * node_mask.astype(jnp.float32)[:, :, None]

    xp = jnp.zeros((B, Np, Dp), compute_dtype).at[:, :N, :D].set(
        x.astype(compute_dtype))
    adjp = jnp.zeros((B, Np, Np), compute_dtype).at[:, :N, :N].set(
        adj_masked.astype(compute_dtype))
    wp = jnp.zeros((L, Dp, Dp), compute_dtype).at[:, :D, :D].set(
        gcn_w.astype(compute_dtype))
    bp = jnp.zeros((L, 1, Dp), jnp.float32).at[:, :, :D].set(
        gcn_b.astype(jnp.float32))

    # --- generation-aware block / VMEM sizing --------------------------------------
    try:
        vmem_cap = int(getattr(pltpu.get_tpu_info(), "vmem_capacity_bytes", 128 << 20))
    except Exception:
        vmem_cap = 128 << 20
    two_tc = vmem_cap <= (64 << 20)          # v7x-class part: 64 MiB VMEM, 2 TensorCores

    cd_size = jnp.dtype(compute_dtype).itemsize
    out_size = jnp.dtype(out_dtype).itemsize
    adj_lane = _round_up(Np, 128)            # VMEM lane-pads the adjacency tile's last dim
    # Honest per-batch-element VMEM: double-buffered pipelined blocks + in-kernel f32
    # temporaries (x / support / out live across the unrolled layer loop) + the f32
    # adjacency copy used on the VPU path.
    per_b = (2 * (Np * Dp * cd_size              # x input block
                  + Np * adj_lane * cd_size      # adjacency block (lane-padded)
                  + Np * Dp * out_size)          # output block
             + 3 * Np * Dp * 4                   # in-kernel f32 x / support / out
             + Np * adj_lane * 4)                # in-kernel f32 adjacency (VPU path)
    # Worst case (fallback) double-buffered weights/biases; bias sublane-pads 1 -> 8.
    weights_bytes = 2 * (L * Dp * Dp * cd_size + L * 8 * Dp * 4)

    if two_tc:
        budget = 26 << 20                    # per-step budget (v7x: 64 MiB physical VMEM)
        vmem_clamp = 48 << 20
    else:
        budget = 56 << 20                    # v5e/v6e: 128 MiB VMEM, single TensorCore
        vmem_clamp = 96 << 20

    bb = max(1, min(B, (budget - weights_bytes) // max(per_b, 1)))
    if two_tc and B >= 2:
        bb = min(bb, (B + 1) // 2)           # keep >= 2 grid steps only on a 2-TC part

    # Pad B up to a multiple of the block (rebalanced so padding < one block) instead
    # of shrinking bb to a divisor of B (prime/odd B would otherwise force bb == 1).
    g = -(-B // bb)                          # number of grid steps
    bb = -(-B // g)                          # rebalance: smallest bb giving g steps
    Bp = g * bb
    if Bp != B:
        xp = jnp.zeros((Bp, Np, Dp), compute_dtype).at[:B].set(xp)
        adjp = jnp.zeros((Bp, Np, Np), compute_dtype).at[:B].set(adjp)

    vmem_limit = int(min(max(bb * per_b + weights_bytes + (6 << 20), 24 << 20),
                         vmem_clamp))

    def _build(single_buffer_weights):
        # Constant-index weight/bias blocks: request single buffering so they are
        # resident once instead of double-buffered (matters on v7x's 64 MiB VMEM).
        wkw = {"pipeline_mode": pl.Buffered(1)} if single_buffer_weights else {}
        return pl.pallas_call(
            _sentence_encoder_kernel,
            out_shape=jax.ShapeDtypeStruct((Bp, Np, Dp), out_dtype),
            grid_spec=pltpu.PrefetchScalarGridSpec(
                num_scalar_prefetch=0,
                grid=(g,),
                in_specs=[
                    pl.BlockSpec((bb, Np, Dp), lambda b: (b, 0, 0)),        # x
                    pl.BlockSpec((bb, Np, Np), lambda b: (b, 0, 0)),        # masked adj
                    pl.BlockSpec((L, Dp, Dp), lambda b: (0, 0, 0), **wkw),  # stacked W
                    pl.BlockSpec((L, 1, Dp), lambda b: (0, 0, 0), **wkw),   # stacked b
                ],
                out_specs=pl.BlockSpec((bb, Np, Dp), lambda b: (b, 0, 0)),
            ),
            compiler_params=pltpu.CompilerParams(
                dimension_semantics=("parallel",),
                vmem_limit_bytes=vmem_limit),
        )

    try:
        out = _build(True)(xp, adjp, wp, bp)
    except Exception:
        # TODO(synk): pl.Buffered(1) rejected on this jax build; fall back to the
        # default double-buffered constant weight blocks (weights are small anyway).
        out = _build(False)(xp, adjp, wp, bp)

    # strip batch / node / feature padding back off
    return out[:B, :N, :D]


def _reference_forward(x, node_mask, adj_mat, gcn_w, gcn_b):
    nm = node_mask[..., None].astype(x.dtype)
    for l in range(gcn_w.shape[0]):
        support = jnp.einsum("bnd,de->bne", x, gcn_w[l]) + gcn_b[l]
        out = jnp.einsum("bnm,bmd->bnd", adj_mat, support)
        out = jnp.maximum(out, 0.0) * nm
        x = x + out
    return x


if __name__ == "__main__":
    # Small, module-consistent shapes.
    B = 2            # batch
    N = 8            # max_num_words
    D = 32           # word_dim
    L = 2            # num_gcn_layers

    key = jax.random.PRNGKey(0)
    kx, kadj, kw, kb = jax.random.split(key, 4)

    x = jax.random.normal(kx, (B, N, D), dtype=jnp.float32)

    # padding / node masks (a couple of masked nodes to exercise the fold)
    mask = jnp.ones((B, N), dtype=jnp.float32)
    node_mask = jnp.ones((B, N), dtype=jnp.float32).at[1, N - 2:].set(0.0)
    node_pos = jnp.tile(jnp.arange(N, dtype=jnp.int32)[None, :], (B, 1))

    # symmetric row-normalized adjacency
    adj_raw = jax.random.uniform(kadj, (B, N, N), dtype=jnp.float32)
    adj_raw = 0.5 * (adj_raw + jnp.swapaxes(adj_raw, 1, 2)) + jnp.eye(N)[None]
    adj_mat = adj_raw / adj_raw.sum(axis=-1, keepdims=True)

    # deterministic GCN parameters (uniform init a la pygcn)
    bound = 1.0 / jnp.sqrt(D)
    gcn_w = jax.random.uniform(kw, (L, D, D), minval=-bound, maxval=bound,
                               dtype=jnp.float32)
    gcn_b = jax.random.uniform(kb, (L, 1, D), minval=-bound, maxval=bound,
                               dtype=jnp.float32)

    ref = _reference_forward(x, node_mask, adj_mat, gcn_w, gcn_b)

    # f32 compute path: tight check against the pure-JAX reference.
    out_f32 = jax.block_until_ready(
        sentence_encoder_forward(x, mask, node_pos, node_mask, adj_mat,
                                 gcn_w, gcn_b, compute_dtype=jnp.float32))
    assert out_f32.shape == (B, N, D)
    assert jnp.allclose(out_f32, ref, atol=1e-5, rtol=1e-5)

    # bf16 MXU path (default for v6e/v7x): relaxed tolerance vs. the f32 reference.
    out_bf16 = jax.block_until_ready(
        sentence_encoder_forward(x, mask, node_pos, node_mask, adj_mat,
                                 gcn_w, gcn_b, compute_dtype=jnp.bfloat16))
    assert out_bf16.shape == (B, N, D)
    assert jnp.allclose(out_bf16, ref, atol=5e-2, rtol=5e-2)

    # Odd batch (B=3): exercises the batch-padding / grid-rebalancing path on 2-TC parts.
    x3 = jnp.concatenate([x, x[:1]], axis=0)
    mask3 = jnp.concatenate([mask, mask[:1]], axis=0)
    node_mask3 = jnp.concatenate([node_mask, node_mask[:1]], axis=0)
    node_pos3 = jnp.concatenate([node_pos, node_pos[:1]], axis=0)
    adj3 = jnp.concatenate([adj_mat, adj_mat[:1]], axis=0)
    ref3 = _reference_forward(x3, node_mask3, adj3, gcn_w, gcn_b)
    out3 = jax.block_until_ready(
        sentence_encoder_forward(x3, mask3, node_pos3, node_mask3, adj3,
                                 gcn_w, gcn_b, compute_dtype=jnp.float32))
    assert out3.shape == (3, N, D)
    assert jnp.allclose(out3, ref3, atol=1e-5, rtol=1e-5)

    print("KERNEL_OK")
</pallas_src>

<mosaic_0001>
module attributes {stable_mosaic.version = 11 : i64} {
  func.func @_sentence_encoder_kernel(%arg0: i32, %arg1: memref<2x8x128xf32, #tpu.memory_space<vmem>>, %arg2: memref<2x8x8xf32, #tpu.memory_space<vmem>>, %arg3: memref<2x128x128xf32, #tpu.memory_space<vmem>>, %arg4: memref<2x1x128xf32, #tpu.memory_space<vmem>>, %arg5: memref<2x8x128xf32, #tpu.memory_space<vmem>>) attributes {dimension_semantics = [#tpu.dimension_semantics<parallel>], iteration_bounds = array<i64: 1>, scalar_prefetch = 0 : i64, scratch_operands = 0 : i64, tpu.core_type = #tpu.core_type<tc>, window_params = [{transform_indices = @transform_0, window_bounds = array<i64: 2, 8, 128>}, {transform_indices = @transform_1, window_bounds = array<i64: 2, 8, 8>}, {pipeline_mode = #tpu.pipeline_mode<synchronous>, transform_indices = @transform_2, window_bounds = array<i64: 2, 128, 128>}, {pipeline_mode = #tpu.pipeline_mode<synchronous>, transform_indices = @transform_3, window_bounds = array<i64: 2, 1, 128>}, {transform_indices = @transform_4, window_bounds = array<i64: 2, 8, 128>}]} {
    %c0 = arith.constant 0 : index
    %c0_0 = arith.constant 0 : index
    %c0_1 = arith.constant 0 : index
    %0 = vector.load %arg1[%c0, %c0_0, %c0_1] : memref<2x8x128xf32, #tpu.memory_space<vmem>>, vector<2x8x128xf32>
    %1 = vector.shape_cast %0 : vector<2x8x128xf32> to vector<16x128xf32>
    %c0_2 = arith.constant 0 : index
    %c0_3 = arith.constant 0 : index
    %c0_4 = arith.constant 0 : index
    %2 = vector.load %arg2[%c0_2, %c0_3, %c0_4] : memref<2x8x8xf32, #tpu.memory_space<vmem>>, vector<2x8x8xf32>
    %c0_5 = arith.constant 0 : index
    %c0_6 = arith.constant 0 : index
    %c0_7 = arith.constant 0 : index
    %3 = vector.load %arg3[%c0_5, %c0_6, %c0_7] : memref<2x128x128xf32, #tpu.memory_space<vmem>>, vector<1x128x128xf32>
    %4 = vector.shape_cast %3 : vector<1x128x128xf32> to vector<128x128xf32>
    %c0_8 = arith.constant 0 : index
    %c0_9 = arith.constant 0 : index
    %c0_10 = arith.constant 0 : index
    %5 = vector.load %arg4[%c0_8, %c0_9, %c0_10] : memref<2x1x128xf32, #tpu.memory_space<vmem>>, vector<1x1x128xf32>
    %6 = vector.shape_cast %5 : vector<1x1x128xf32> to vector<1x128xf32>
    %cst = arith.constant dense<0.000000e+00> : vector<16x128xf32>
    %7 = tpu.matmul %1, %4, %cst {dimension_numbers = #tpu.dot_dimension_numbers<[1], [0], [0], [1], [0, 0, 1, 1], [], []>} : vector<16x128xf32>, vector<128x128xf32>, vector<16x128xf32> -> vector<16x128xf32>
    %8 = vector.broadcast %6 : vector<1x128xf32> to vector<16x128xf32>
    %9 = arith.addf %7, %8 : vector<16x128xf32>
    %10 = vector.shape_cast %9 : vector<16x128xf32> to vector<2x8x128xf32>
    %11 = vector.extract_strided_slice %2 {offsets = [0, 0, 0], sizes = [2, 8, 1], strides = [1, 1, 1]} : vector<2x8x8xf32> to vector<2x8x1xf32>
    %12 = vector.extract_strided_slice %10 {offsets = [0, 0, 0], sizes = [2, 1, 128], strides = [1, 1, 1]} : vector<2x8x128xf32> to vector<2x1x128xf32>
    %13 = vector.broadcast %11 : vector<2x8x1xf32> to vector<2x8x128xf32>
    %14 = vector.broadcast %12 : vector<2x1x128xf32> to vector<2x8x128xf32>
    %15 = arith.mulf %13, %14 : vector<2x8x128xf32>
    %16 = vector.extract_strided_slice %2 {offsets = [0, 0, 1], sizes = [2, 8, 1], strides = [1, 1, 1]} : vector<2x8x8xf32> to vector<2x8x1xf32>
    %17 = vector.extract_strided_slice %10 {offsets = [0, 1, 0], sizes = [2, 1, 128], strides = [1, 1, 1]} : vector<2x8x128xf32> to vector<2x1x128xf32>
    %18 = vector.broadcast %16 : vector<2x8x1xf32> to vector<2x8x128xf32>
    %19 = vector.broadcast %17 : vector<2x1x128xf32> to vector<2x8x128xf32>
    %20 = arith.mulf %18, %19 : vector<2x8x128xf32>
    %21 = arith.addf %15, %20 : vector<2x8x128xf32>
    %22 = vector.extract_strided_slice %2 {offsets = [0, 0, 2], sizes = [2, 8, 1], strides = [1, 1, 1]} : vector<2x8x8xf32> to vector<2x8x1xf32>
    %23 = vector.extract_strided_slice %10 {offsets = [0, 2, 0], sizes = [2, 1, 128], strides = [1, 1, 1]} : vector<2x8x128xf32> to vector<2x1x128xf32>
    %24 = vector.broadcast %22 : vector<2x8x1xf32> to vector<2x8x128xf32>
    %25 = vector.broadcast %23 : vector<2x1x128xf32> to vector<2x8x128xf32>
    %26 = arith.mulf %24, %25 : vector<2x8x128xf32>
    %27 = arith.addf %21, %26 : vector<2x8x128xf32>
    %28 = vector.extract_strided_slice %2 {offsets = [0, 0, 3], sizes = [2, 8, 1], strides = [1, 1, 1]} : vector<2x8x8xf32> to vector<2x8x1xf32>
    %29 = vector.extract_strided_slice %10 {offsets = [0, 3, 0], sizes = [2, 1, 128], strides = [1, 1, 1]} : vector<2x8x128xf32> to vector<2x1x128xf32>
    %30 = vector.broadcast %28 : vector<2x8x1xf32> to vector<2x8x128xf32>
    %31 = vector.broadcast %29 : vector<2x1x128xf32> to vector<2x8x128xf32>
    %32 = arith.mulf %30, %31 : vector<2x8x128xf32>
    %33 = arith.addf %27, %32 : vector<2x8x128xf32>
    %34 = vector.extract_strided_slice %2 {offsets = [0, 0, 4], sizes = [2, 8, 1], strides = [1, 1, 1]} : vector<2x8x8xf32> to vector<2x8x1xf32>
    %35 = vector.extract_strided_slice %10 {offsets = [0, 4, 0], sizes = [2, 1, 128], strides = [1, 1, 1]} : vector<2x8x128xf32> to vector<2x1x128xf32>
    %36 = vector.broadcast %34 : vector<2x8x1xf32> to vector<2x8x128xf32>
    %37 = vector.broadcast %35 : vector<2x1x128xf32> to vector<2x8x128xf32>
    %38 = arith.mulf %36, %37 : vector<2x8x128xf32>
    %39 = arith.addf %33, %38 : vector<2x8x128xf32>
    %40 = vector.extract_strided_slice %2 {offsets = [0, 0, 5], sizes = [2, 8, 1], strides = [1, 1, 1]} : vector<2x8x8xf32> to vector<2x8x1xf32>
    %41 = vector.extract_strided_slice %10 {offsets = [0, 5, 0], sizes = [2, 1, 128], strides = [1, 1, 1]} : vector<2x8x128xf32> to vector<2x1x128xf32>
    %42 = vector.broadcast %40 : vector<2x8x1xf32> to vector<2x8x128xf32>
    %43 = vector.broadcast %41 : vector<2x1x128xf32> to vector<2x8x128xf32>
    %44 = arith.mulf %42, %43 : vector<2x8x128xf32>
    %45 = arith.addf %39, %44 : vector<2x8x128xf32>
    %46 = vector.extract_strided_slice %2 {offsets = [0, 0, 6], sizes = [2, 8, 1], strides = [1, 1, 1]} : vector<2x8x8xf32> to vector<2x8x1xf32>
    %47 = vector.extract_strided_slice %10 {offsets = [0, 6, 0], sizes = [2, 1, 128], strides = [1, 1, 1]} : vector<2x8x128xf32> to vector<2x1x128xf32>
    %48 = vector.broadcast %46 : vector<2x8x1xf32> to vector<2x8x128xf32>
    %49 = vector.broadcast %47 : vector<2x1x128xf32> to vector<2x8x128xf32>
    %50 = arith.mulf %48, %49 : vector<2x8x128xf32>
    %51 = arith.addf %45, %50 : vector<2x8x128xf32>
    %52 = vector.extract_strided_slice %2 {offsets = [0, 0, 7], sizes = [2, 8, 1], strides = [1, 1, 1]} : vector<2x8x8xf32> to vector<2x8x1xf32>
    %53 = vector.extract_strided_slice %10 {offsets = [0, 7, 0], sizes = [2, 1, 128], strides = [1, 1, 1]} : vector<2x8x128xf32> to vector<2x1x128xf32>
    %54 = vector.broadcast %52 : vector<2x8x1xf32> to vector<2x8x128xf32>
    %55 = vector.broadcast %53 : vector<2x1x128xf32> to vector<2x8x128xf32>
    %56 = arith.mulf %54, %55 : vector<2x8x128xf32>
    %57 = arith.addf %51, %56 : vector<2x8x128xf32>
    %cst_11 = arith.constant 0.000000e+00 : f32
    %58 = vector.broadcast %cst_11 : f32 to vector<2x8x128xf32>
    %59 = arith.maximumf %57, %58 : vector<2x8x128xf32>
    %60 = vector.shape_cast %59 : vector<2x8x128xf32> to vector<16x128xf32>
    %61 = arith.addf %1, %60 : vector<16x128xf32>
    %c1 = arith.constant 1 : index
    %c0_12 = arith.constant 0 : index
    %c0_13 = arith.constant 0 : index
    %62 = vector.load %arg3[%c1, %c0_12, %c0_13] : memref<2x128x128xf32, #tpu.memory_space<vmem>>, vector<1x128x128xf32>
    %63 = vector.shape_cast %62 : vector<1x128x128xf32> to vector<128x128xf32>
    %c1_14 = arith.constant 1 : index
    %c0_15 = arith.constant 0 : index
    %c0_16 = arith.constant 0 : index
    %64 = vector.load %arg4[%c1_14, %c0_15, %c0_16] : memref<2x1x128xf32, #tpu.memory_space<vmem>>, vector<1x1x128xf32>
    %65 = vector.shape_cast %64 : vector<1x1x128xf32> to vector<1x128xf32>
    %cst_17 = arith.constant dense<0.000000e+00> : vector<16x128xf32>
    %66 = tpu.matmul %61, %63, %cst_17 {dimension_numbers = #tpu.dot_dimension_numbers<[1], [0], [0], [1], [0, 0, 1, 1], [], []>} : vector<16x128xf32>, vector<128x128xf32>, vector<16x128xf32> -> vector<16x128xf32>
    %67 = vector.broadcast %65 : vector<1x128xf32> to vector<16x128xf32>
    %68 = arith.addf %66, %67 : vector<16x128xf32>
    %69 = vector.shape_cast %68 : vector<16x128xf32> to vector<2x8x128xf32>
    %70 = vector.extract_strided_slice %2 {offsets = [0, 0, 0], sizes = [2, 8, 1], strides = [1, 1, 1]} : vector<2x8x8xf32> to vector<2x8x1xf32>
    %71 = vector.extract_strided_slice %69 {offsets = [0, 0, 0], sizes = [2, 1, 128], strides = [1, 1, 1]} : vector<2x8x128xf32> to vector<2x1x128xf32>
    %72 = vector.broadcast %70 : vector<2x8x1xf32> to vector<2x8x128xf32>
    %73 = vector.broadcast %71 : vector<2x1x128xf32> to vector<2x8x128xf32>
    %74 = arith.mulf %72, %73 : vector<2x8x128xf32>
    %75 = vector.extract_strided_slice %2 {offsets = [0, 0, 1], sizes = [2, 8, 1], strides = [1, 1, 1]} : vector<2x8x8xf32> to vector<2x8x1xf32>
    %76 = vector.extract_strided_slice %69 {offsets = [0, 1, 0], sizes = [2, 1, 128], strides = [1, 1, 1]} : vector<2x8x128xf32> to vector<2x1x128xf32>
    %77 = vector.broadcast %75 : vector<2x8x1xf32> to vector<2x8x128xf32>
    %78 = vector.broadcast %76 : vector<2x1x128xf32> to vector<2x8x128xf32>
    %79 = arith.mulf %77, %78 : vector<2x8x128xf32>
    %80 = arith.addf %74, %79 : vector<2x8x128xf32>
    %81 = vector.extract_strided_slice %2 {offsets = [0, 0, 2], sizes = [2, 8, 1], strides = [1, 1, 1]} : vector<2x8x8xf32> to vector<2x8x1xf32>
    %82 = vector.extract_strided_slice %69 {offsets = [0, 2, 0], sizes = [2, 1, 128], strides = [1, 1, 1]} : vector<2x8x128xf32> to vector<2x1x128xf32>
    %83 = vector.broadcast %81 : vector<2x8x1xf32> to vector<2x8x128xf32>
    %84 = vector.broadcast %82 : vector<2x1x128xf32> to vector<2x8x128xf32>
    %85 = arith.mulf %83, %84 : vector<2x8x128xf32>
    %86 = arith.addf %80, %85 : vector<2x8x128xf32>
    %87 = vector.extract_strided_slice %2 {offsets = [0, 0, 3], sizes = [2, 8, 1], strides = [1, 1, 1]} : vector<2x8x8xf32> to vector<2x8x1xf32>
    %88 = vector.extract_strided_slice %69 {offsets = [0, 3, 0], sizes = [2, 1, 128], strides = [1, 1, 1]} : vector<2x8x128xf32> to vector<2x1x128xf32>
    %89 = vector.broadcast %87 : vector<2x8x1xf32> to vector<2x8x128xf32>
    %90 = vector.broadcast %88 : vector<2x1x128xf32> to vector<2x8x128xf32>
    %91 = arith.mulf %89, %90 : vector<2x8x128xf32>
    %92 = arith.addf %86, %91 : vector<2x8x128xf32>
    %93 = vector.extract_strided_slice %2 {offsets = [0, 0, 4], sizes = [2, 8, 1], strides = [1, 1, 1]} : vector<2x8x8xf32> to vector<2x8x1xf32>
    %94 = vector.extract_strided_slice %69 {offsets = [0, 4, 0], sizes = [2, 1, 128], strides = [1, 1, 1]} : vector<2x8x128xf32> to vector<2x1x128xf32>
    %95 = vector.broadcast %93 : vector<2x8x1xf32> to vector<2x8x128xf32>
    %96 = vector.broadcast %94 : vector<2x1x128xf32> to vector<2x8x128xf32>
    %97 = arith.mulf %95, %96 : vector<2x8x128xf32>
    %98 = arith.addf %92, %97 : vector<2x8x128xf32>
    %99 = vector.extract_strided_slice %2 {offsets = [0, 0, 5], sizes = [2, 8, 1], strides = [1, 1, 1]} : vector<2x8x8xf32> to vector<2x8x1xf32>
    %100 = vector.extract_strided_slice %69 {offsets = [0, 5, 0], sizes = [2, 1, 128], strides = [1, 1, 1]} : vector<2x8x128xf32> to vector<2x1x128xf32>
    %101 = vector.broadcast %99 : vector<2x8x1xf32> to vector<2x8x128xf32>
    %102 = vector.broadcast %100 : vector<2x1x128xf32> to vector<2x8x128xf32>
    %103 = arith.mulf %101, %102 : vector<2x8x128xf32>
    %104 = arith.addf %98, %103 : vector<2x8x128xf32>
    %105 = vector.extract_strided_slice %2 {offsets = [0, 0, 6], sizes = [2, 8, 1], strides = [1, 1, 1]} : vector<2x8x8xf32> to vector<2x8x1xf32>
    %106 = vector.extract_strided_slice %69 {offsets = [0, 6, 0], sizes = [2, 1, 128], strides = [1, 1, 1]} : vector<2x8x128xf32> to vector<2x1x128xf32>
    %107 = vector.broadcast %105 : vector<2x8x1xf32> to vector<2x8x128xf32>
    %108 = vector.broadcast %106 : vector<2x1x128xf32> to vector<2x8x128xf32>
    %109 = arith.mulf %107, %108 : vector<2x8x128xf32>
    %110 = arith.addf %104, %109 : vector<2x8x128xf32>
    %111 = vector.extract_strided_slice %2 {offsets = [0, 0, 7], sizes = [2, 8, 1], strides = [1, 1, 1]} : vector<2x8x8xf32> to vector<2x8x1xf32>
    %112 = vector.extract_strided_slice %69 {offsets = [0, 7, 0], sizes = [2, 1, 128], strides = [1, 1, 1]} : vector<2x8x128xf32> to vector<2x1x128xf32>
    %113 = vector.broadcast %111 : vector<2x8x1xf32> to vector<2x8x128xf32>
    %114 = vector.broadcast %112 : vector<2x1x128xf32> to vector<2x8x128xf32>
    %115 = arith.mulf %113, %114 : vector<2x8x128xf32>
    %116 = arith.addf %110, %115 : vector<2x8x128xf32>
    %cst_18 = arith.constant 0.000000e+00 : f32
    %117 = vector.broadcast %cst_18 : f32 to vector<2x8x128xf32>
    %118 = arith.maximumf %116, %117 : vector<2x8x128xf32>
    %119 = vector.shape_cast %118 : vector<2x8x128xf32> to vector<16x128xf32>
    %120 = arith.addf %61, %119 : vector<16x128xf32>
    %121 = vector.shape_cast %120 : vector<16x128xf32> to vector<2x8x128xf32>
    %c0_19 = arith.constant 0 : index
    %c0_20 = arith.constant 0 : index
    %c0_21 = arith.constant 0 : index
    %122 = vector.load %arg5[%c0_19, %c0_20, %c0_21] : memref<2x8x128xf32, #tpu.memory_space<vmem>>, vector<2x8x128xf32>
    tpu.vector_store %arg5[%c0_19, %c0_20, %c0_21], %121 {strides = array<i32>} : memref<2x8x128xf32, #tpu.memory_space<vmem>>, vector<2x8x128xf32>,
    return
  }
  func.func @transform_0(%arg0: i32) -> (i32, i32, i32) {
    %c0_i32 = arith.constant 0 : i32
    %c0_i32_0 = arith.constant 0 : i32
    %c0_i32_1 = arith.constant 0 : i32
    return %arg0, %c0_i32, %c0_i32_0 : i32, i32, i32
  }
  func.func @transform_1(%arg0: i32) -> (i32, i32, i32) {
    %c0_i32 = arith.constant 0 : i32
    %c0_i32_0 = arith.constant 0 : i32
    %c0_i32_1 = arith.constant 0 : i32
    return %arg0, %c0_i32, %c0_i32_0 : i32, i32, i32
  }
  func.func @transform_2(%arg0: i32) -> (i32, i32, i32) {
    %c0_i32 = arith.constant 0 : i32
    %c0_i32_0 = arith.constant 0 : i32
    %c0_i32_1 = arith.constant 0 : i32
    %c0_i32_2 = arith.constant 0 : i32
    return %c0_i32, %c0_i32_0, %c0_i32_1 : i32, i32, i32
  }
  func.func @transform_3(%arg0: i32) -> (i32, i32, i32) {
    %c0_i32 = arith.constant 0 : i32
    %c0_i32_0 = arith.constant 0 : i32
    %c0_i32_1 = arith.constant 0 : i32
    %c0_i32_2 = arith.constant 0 : i32
    return %c0_i32, %c0_i32_0, %c0_i32_1 : i32, i32, i32
  }
  func.func @transform_4(%arg0: i32) -> (i32, i32, i32) {
    %c0_i32 = arith.constant 0 : i32
    %c0_i32_0 = arith.constant 0 : i32
    %c0_i32_1 = arith.constant 0 : i32
    return %arg0, %c0_i32, %c0_i32_0 : i32, i32, i32
  }
}

module attributes {stable_mosaic.version = 11 : i64} {
  func.func @_sentence_encoder_kernel(%arg0: i32, %arg1: memref<2x8x128xf32, #tpu.memory_space<vmem>>, %arg2: memref<2x8x8xf32, #tpu.memory_space<vmem>>, %arg3: memref<2x128x128xf32, #tpu.memory_space<vmem>>, %arg4: memref<2x1x128xf32, #tpu.memory_space<vmem>>, %arg5: memref<2x8x128xf32, #tpu.memory_space<vmem>>) attributes {dimension_semantics = [#tpu.dimension_semantics<parallel>], iteration_bounds = array<i64: 1>, scalar_prefetch = 0 : i64, scratch_operands = 0 : i64, tpu.core_type = #tpu.core_type<tc>, window_params = [{transform_indices = @transform_0, window_bounds = array<i64: 2, 8, 128>}, {transform_indices = @transform_1, window_bounds = array<i64: 2, 8, 8>}, {pipeline_mode = #tpu.pipeline_mode<synchronous>, transform_indices = @transform_2, window_bounds = array<i64: 2, 128, 128>}, {pipeline_mode = #tpu.pipeline_mode<synchronous>, transform_indices = @transform_3, window_bounds = array<i64: 2, 1, 128>}, {transform_indices = @transform_4, window_bounds = array<i64: 2, 8, 128>}]} {
    %c0 = arith.constant 0 : index
    %c0_0 = arith.constant 0 : index
    %c0_1 = arith.constant 0 : index
    %0 = vector.load %arg1[%c0, %c0_0, %c0_1] : memref<2x8x128xf32, #tpu.memory_space<vmem>>, vector<2x8x128xf32>
    %1 = vector.shape_cast %0 : vector<2x8x128xf32> to vector<16x128xf32>
    %c0_2 = arith.constant 0 : index
    %c0_3 = arith.constant 0 : index
    %c0_4 = arith.constant 0 : index
    %2 = vector.load %arg2[%c0_2, %c0_3, %c0_4] : memref<2x8x8xf32, #tpu.memory_space<vmem>>, vector<2x8x8xf32>
    %c0_5 = arith.constant 0 : index
    %c0_6 = arith.constant 0 : index
    %c0_7 = arith.constant 0 : index
    %3 = vector.load %arg3[%c0_5, %c0_6, %c0_7] : memref<2x128x128xf32, #tpu.memory_space<vmem>>, vector<1x128x128xf32>
    %4 = vector.shape_cast %3 : vector<1x128x128xf32> to vector<128x128xf32>
    %c0_8 = arith.constant 0 : index
    %c0_9 = arith.constant 0 : index
    %c0_10 = arith.constant 0 : index
    %5 = vector.load %arg4[%c0_8, %c0_9, %c0_10] : memref<2x1x128xf32, #tpu.memory_space<vmem>>, vector<1x1x128xf32>
    %6 = vector.shape_cast %5 : vector<1x1x128xf32> to vector<1x128xf32>
    %cst = arith.constant dense<0.000000e+00> : vector<16x128xf32>
    %7 = tpu.matmul %1, %4, %cst {dimension_numbers = #tpu.dot_dimension_numbers<[1], [0], [0], [1], [0, 0, 1, 1], [], []>} : vector<16x128xf32>, vector<128x128xf32>, vector<16x128xf32> -> vector<16x128xf32>
    %8 = vector.broadcast %6 : vector<1x128xf32> to vector<16x128xf32>
    %9 = arith.addf %7, %8 : vector<16x128xf32>
    %10 = vector.shape_cast %9 : vector<16x128xf32> to vector<2x8x128xf32>
    %11 = vector.extract_strided_slice %2 {offsets = [0, 0, 0], sizes = [2, 8, 1], strides = [1, 1, 1]} : vector<2x8x8xf32> to vector<2x8x1xf32>
    %12 = vector.extract_strided_slice %10 {offsets = [0, 0, 0], sizes = [2, 1, 128], strides = [1, 1, 1]} : vector<2x8x128xf32> to vector<2x1x128xf32>
    %13 = vector.broadcast %11 : vector<2x8x1xf32> to vector<2x8x128xf32>
    %14 = vector.broadcast %12 : vector<2x1x128xf32> to vector<2x8x128xf32>
    %15 = arith.mulf %13, %14 : vector<2x8x128xf32>
    %16 = vector.extract_strided_slice %2 {offsets = [0, 0, 1], sizes = [2, 8, 1], strides = [1, 1, 1]} : vector<2x8x8xf32> to vector<2x8x1xf32>
    %17 = vector.extract_strided_slice %10 {offsets = [0, 1, 0], sizes = [2, 1, 128], strides = [1, 1, 1]} : vector<2x8x128xf32> to vector<2x1x128xf32>
    %18 = vector.broadcast %16 : vector<2x8x1xf32> to vector<2x8x128xf32>
    %19 = vector.broadcast %17 : vector<2x1x128xf32> to vector<2x8x128xf32>
    %20 = arith.mulf %18, %19 : vector<2x8x128xf32>
    %21 = arith.addf %15, %20 : vector<2x8x128xf32>
    %22 = vector.extract_strided_slice %2 {offsets = [0, 0, 2], sizes = [2, 8, 1], strides = [1, 1, 1]} : vector<2x8x8xf32> to vector<2x8x1xf32>
    %23 = vector.extract_strided_slice %10 {offsets = [0, 2, 0], sizes = [2, 1, 128], strides = [1, 1, 1]} : vector<2x8x128xf32> to vector<2x1x128xf32>
    %24 = vector.broadcast %22 : vector<2x8x1xf32> to vector<2x8x128xf32>
    %25 = vector.broadcast %23 : vector<2x1x128xf32> to vector<2x8x128xf32>
    %26 = arith.mulf %24, %25 : vector<2x8x128xf32>
    %27 = arith.addf %21, %26 : vector<2x8x128xf32>
    %28 = vector.extract_strided_slice %2 {offsets = [0, 0, 3], sizes = [2, 8, 1], strides = [1, 1, 1]} : vector<2x8x8xf32> to vector<2x8x1xf32>
    %29 = vector.extract_strided_slice %10 {offsets = [0, 3, 0], sizes = [2, 1, 128], strides = [1, 1, 1]} : vector<2x8x128xf32> to vector<2x1x128xf32>
    %30 = vector.broadcast %28 : vector<2x8x1xf32> to vector<2x8x128xf32>
    %31 = vector.broadcast %29 : vector<2x1x128xf32> to vector<2x8x128xf32>
    %32 = arith.mulf %30, %31 : vector<2x8x128xf32>
    %33 = arith.addf %27, %32 : vector<2x8x128xf32>
    %34 = vector.extract_strided_slice %2 {offsets = [0, 0, 4], sizes = [2, 8, 1], strides = [1, 1, 1]} : vector<2x8x8xf32> to vector<2x8x1xf32>
    %35 = vector.extract_strided_slice %10 {offsets = [0, 4, 0], sizes = [2, 1, 128], strides = [1, 1, 1]} : vector<2x8x128xf32> to vector<2x1x128xf32>
    %36 = vector.broadcast %34 : vector<2x8x1xf32> to vector<2x8x128xf32>
    %37 = vector.broadcast %35 : vector<2x1x128xf32> to vector<2x8x128xf32>
    %38 = arith.mulf %36, %37 : vector<2x8x128xf32>
    %39 = arith.addf %33, %38 : vector<2x8x128xf32>
    %40 = vector.extract_strided_slice %2 {offsets = [0, 0, 5], sizes = [2, 8, 1], strides = [1, 1, 1]} : vector<2x8x8xf32> to vector<2x8x1xf32>
    %41 = vector.extract_strided_slice %10 {offsets = [0, 5, 0], sizes = [2, 1, 128], strides = [1, 1, 1]} : vector<2x8x128xf32> to vector<2x1x128xf32>
    %42 = vector.broadcast %40 : vector<2x8x1xf32> to vector<2x8x128xf32>
    %43 = vector.broadcast %41 : vector<2x1x128xf32> to vector<2x8x128xf32>
    %44 = arith.mulf %42, %43 : vector<2x8x128xf32>
    %45 = arith.addf %39, %44 : vector<2x8x128xf32>
    %46 = vector.extract_strided_slice %2 {offsets = [0, 0, 6], sizes = [2, 8, 1], strides = [1, 1, 1]} : vector<2x8x8xf32> to vector<2x8x1xf32>
    %47 = vector.extract_strided_slice %10 {offsets = [0, 6, 0], sizes = [2, 1, 128], strides = [1, 1, 1]} : vector<2x8x128xf32> to vector<2x1x128xf32>
    %48 = vector.broadcast %46 : vector<2x8x1xf32> to vector<2x8x128xf32>
    %49 = vector.broadcast %47 : vector<2x1x128xf32> to vector<2x8x128xf32>
    %50 = arith.mulf %48, %49 : vector<2x8x128xf32>
    %51 = arith.addf %45, %50 : vector<2x8x128xf32>
    %52 = vector.extract_strided_slice %2 {offsets = [0, 0, 7], sizes = [2, 8, 1], strides = [1, 1, 1]} : vector<2x8x8xf32> to vector<2x8x1xf32>
    %53 = vector.extract_strided_slice %10 {offsets = [0, 7, 0], sizes = [2, 1, 128], strides = [1, 1, 1]} : vector<2x8x128xf32> to vector<2x1x128xf32>
    %54 = vector.broadcast %52 : vector<2x8x1xf32> to vector<2x8x128xf32>
    %55 = vector.broadcast %53 : vector<2x1x128xf32> to vector<2x8x128xf32>
    %56 = arith.mulf %54, %55 : vector<2x8x128xf32>
    %57 = arith.addf %51, %56 : vector<2x8x128xf32>
    %cst_11 = arith.constant 0.000000e+00 : f32
    %58 = vector.broadcast %cst_11 : f32 to vector<2x8x128xf32>
    %59 = arith.maximumf %57, %58 : vector<2x8x128xf32>
    %60 = vector.shape_cast %59 : vector<2x8x128xf32> to vector<16x128xf32>
    %61 = arith.addf %1, %60 : vector<16x128xf32>
    %c1 = arith.constant 1 : index
    %c0_12 = arith.constant 0 : index
    %c0_13 = arith.constant 0 : index
    %62 = vector.load %arg3[%c1, %c0_12, %c0_13] : memref<2x128x128xf32, #tpu.memory_space<vmem>>, vector<1x128x128xf32>
    %63 = vector.shape_cast %62 : vector<1x128x128xf32> to vector<128x128xf32>
    %c1_14 = arith.constant 1 : index
    %c0_15 = arith.constant 0 : index
    %c0_16 = arith.constant 0 : index
    %64 = vector.load %arg4[%c1_14, %c0_15, %c0_16] : memref<2x1x128xf32, #tpu.memory_space<vmem>>, vector<1x1x128xf32>
    %65 = vector.shape_cast %64 : vector<1x1x128xf32> to vector<1x128xf32>
    %cst_17 = arith.constant dense<0.000000e+00> : vector<16x128xf32>
    %66 = tpu.matmul %61, %63, %cst_17 {dimension_numbers = #tpu.dot_dimension_numbers<[1], [0], [0], [1], [0, 0, 1, 1], [], []>} : vector<16x128xf32>, vector<128x128xf32>, vector<16x128xf32> -> vector<16x128xf32>
    %67 = vector.broadcast %65 : vector<1x128xf32> to vector<16x128xf32>
    %68 = arith.addf %66, %67 : vector<16x128xf32>
    %69 = vector.shape_cast %68 : vector<16x128xf32> to vector<2x8x128xf32>
    %70 = vector.extract_strided_slice %2 {offsets = [0, 0, 0], sizes = [2, 8, 1], strides = [1, 1, 1]} : vector<2x8x8xf32> to vector<2x8x1xf32>
    %71 = vector.extract_strided_slice %69 {offsets = [0, 0, 0], sizes = [2, 1, 128], strides = [1, 1, 1]} : vector<2x8x128xf32> to vector<2x1x128xf32>
    %72 = vector.broadcast %70 : vector<2x8x1xf32> to vector<2x8x128xf32>
    %73 = vector.broadcast %71 : vector<2x1x128xf32> to vector<2x8x128xf32>
    %74 = arith.mulf %72, %73 : vector<2x8x128xf32>
    %75 = vector.extract_strided_slice %2 {offsets = [0, 0, 1], sizes = [2, 8, 1], strides = [1, 1, 1]} : vector<2x8x8xf32> to vector<2x8x1xf32>
    %76 = vector.extract_strided_slice %69 {offsets = [0, 1, 0], sizes = [2, 1, 128], strides = [1, 1, 1]} : vector<2x8x128xf32> to vector<2x1x128xf32>
    %77 = vector.broadcast %75 : vector<2x8x1xf32> to vector<2x8x128xf32>
    %78 = vector.broadcast %76 : vector<2x1x128xf32> to vector<2x8x128xf32>
    %79 = arith.mulf %77, %78 : vector<2x8x128xf32>
    %80 = arith.addf %74, %79 : vector<2x8x128xf32>
    %81 = vector.extract_strided_slice %2 {offsets = [0, 0, 2], sizes = [2, 8, 1], strides = [1, 1, 1]} : vector<2x8x8xf32> to vector<2x8x1xf32>
    %82 = vector.extract_strided_slice %69 {offsets = [0, 2, 0], sizes = [2, 1, 128], strides = [1, 1, 1]} : vector<2x8x128xf32> to vector<2x1x128xf32>
    %83 = vector.broadcast %81 : vector<2x8x1xf32> to vector<2x8x128xf32>
    %84 = vector.broadcast %82 : vector<2x1x128xf32> to vector<2x8x128xf32>
    %85 = arith.mulf %83, %84 : vector<2x8x128xf32>
    %86 = arith.addf %80, %85 : vector<2x8x128xf32>
    %87 = vector.extract_strided_slice %2 {offsets = [0, 0, 3], sizes = [2, 8, 1], strides = [1, 1, 1]} : vector<2x8x8xf32> to vector<2x8x1xf32>
    %88 = vector.extract_strided_slice %69 {offsets = [0, 3, 0], sizes = [2, 1, 128], strides = [1, 1, 1]} : vector<2x8x128xf32> to vector<2x1x128xf32>
    %89 = vector.broadcast %87 : vector<2x8x1xf32> to vector<2x8x128xf32>
    %90 = vector.broadcast %88 : vector<2x1x128xf32> to vector<2x8x128xf32>
    %91 = arith.mulf %89, %90 : vector<2x8x128xf32>
    %92 = arith.addf %86, %91 : vector<2x8x128xf32>
    %93 = vector.extract_strided_slice %2 {offsets = [0, 0, 4], sizes = [2, 8, 1], strides = [1, 1, 1]} : vector<2x8x8xf32> to vector<2x8x1xf32>
    %94 = vector.extract_strided_slice %69 {offsets = [0, 4, 0], sizes = [2, 1, 128], strides = [1, 1, 1]} : vector<2x8x128xf32> to vector<2x1x128xf32>
    %95 = vector.broadcast %93 : vector<2x8x1xf32> to vector<2x8x128xf32>
    %96 = vector.broadcast %94 : vector<2x1x128xf32> to vector<2x8x128xf32>
    %97 = arith.mulf %95, %96 : vector<2x8x128xf32>
    %98 = arith.addf %92, %97 : vector<2x8x128xf32>
    %99 = vector.extract_strided_slice %2 {offsets = [0, 0, 5], sizes = [2, 8, 1], strides = [1, 1, 1]} : vector<2x8x8xf32> to vector<2x8x1xf32>
    %100 = vector.extract_strided_slice %69 {offsets = [0, 5, 0], sizes = [2, 1, 128], strides = [1, 1, 1]} : vector<2x8x128xf32> to vector<2x1x128xf32>
    %101 = vector.broadcast %99 : vector<2x8x1xf32> to vector<2x8x128xf32>
    %102 = vector.broadcast %100 : vector<2x1x128xf32> to vector<2x8x128xf32>
    %103 = arith.mulf %101, %102 : vector<2x8x128xf32>
    %104 = arith.addf %98, %103 : vector<2x8x128xf32>
    %105 = vector.extract_strided_slice %2 {offsets = [0, 0, 6], sizes = [2, 8, 1], strides = [1, 1, 1]} : vector<2x8x8xf32> to vector<2x8x1xf32>
    %106 = vector.extract_strided_slice %69 {offsets = [0, 6, 0], sizes = [2, 1, 128], strides = [1, 1, 1]} : vector<2x8x128xf32> to vector<2x1x128xf32>
    %107 = vector.broadcast %105 : vector<2x8x1xf32> to vector<2x8x128xf32>
    %108 = vector.broadcast %106 : vector<2x1x128xf32> to vector<2x8x128xf32>
    %109 = arith.mulf %107, %108 : vector<2x8x128xf32>
    %110 = arith.addf %104, %109 : vector<2x8x128xf32>
    %111 = vector.extract_strided_slice %2 {offsets = [0, 0, 7], sizes = [2, 8, 1], strides = [1, 1, 1]} : vector<2x8x8xf32> to vector<2x8x1xf32>
    %112 = vector.extract_strided_slice %69 {offsets = [0, 7, 0], sizes = [2, 1, 128], strides = [1, 1, 1]} : vector<2x8x128xf32> to vector<2x1x128xf32>
    %113 = vector.broadcast %111 : vector<2x8x1xf32> to vector<2x8x128xf32>
    %114 = vector.broadcast %112 : vector<2x1x128xf32> to vector<2x8x128xf32>
    %115 = arith.mulf %113, %114 : vector<2x8x128xf32>
    %116 = arith.addf %110, %115 : vector<2x8x128xf32>
    %cst_18 = arith.constant 0.000000e+00 : f32
    %117 = vector.broadcast %cst_18 : f32 to vector<2x8x128xf32>
    %118 = arith.maximumf %116, %117 : vector<2x8x128xf32>
    %119 = vector.shape_cast %118 : vector<2x8x128xf32> to vector<16x128xf32>
    %120 = arith.addf %61, %119 : vector<16x128xf32>
    %121 = vector.shape_cast %120 : vector<16x128xf32> to vector<2x8x128xf32>
    %c0_19 = arith.constant 0 : index
    %c0_20 = arith.constant 0 : index
    %c0_21 = arith.constant 0 : index
    %122 = vector.load %arg5[%c0_19, %c0_20, %c0_21] : memref<2x8x128xf32, #tpu.memory_space<vmem>>, vector<2x8x128xf32>
    tpu.vector_store %arg5[%c0_19, %c0_20, %c0_21], %121 {strides = array<i32>} : memref<2x8x128xf32, #tpu.memory_space<vmem>>, vector<2x8x128xf32>,
    return
  }
  func.func @transform_0(%arg0: i32) -> (i32, i32, i32) {
    %c0_i32 = arith.constant 0 : i32
    %c0_i32_0 = arith.constant 0 : i32
    %c0_i32_1 = arith.constant 0 : i32
    return %arg0, %c0_i32, %c0_i32_0 : i32, i32, i32
  }
  func.func @transform_1(%arg0: i32) -> (i32, i32, i32) {
    %c0_i32 = arith.constant 0 : i32
    %c0_i32_0 = arith.constant 0 : i32
    %c0_i32_1 = arith.constant 0 : i32
    return %arg0, %c0_i32, %c0_i32_0 : i32, i32, i32
  }
  func.func @transform_2(%arg0: i32) -> (i32, i32, i32) {
    %c0_i32 = arith.constant 0 : i32
    %c0_i32_0 = arith.constant 0 : i32
    %c0_i32_1 = arith.constant 0 : i32
    %c0_i32_2 = arith.constant 0 : i32
    return %c0_i32, %c0_i32_0, %c0_i32_1 : i32, i32, i32
  }
  func.func @transform_3(%arg0: i32) -> (i32, i32, i32) {
    %c0_i32 = arith.constant 0 : i32
    %c0_i32_0 = arith.constant 0 : i32
    %c0_i32_1 = arith.constant 0 : i32
    %c0_i32_2 = arith.constant 0 : i32
    return %c0_i32, %c0_i32_0, %c0_i32_1 : i32, i32, i32
  }
  func.func @transform_4(%arg0: i32) -> (i32, i32, i32) {
    %c0_i32 = arith.constant 0 : i32
    %c0_i32_0 = arith.constant 0 : i32
    %c0_i32_1 = arith.constant 0 : i32
    return %arg0, %c0_i32, %c0_i32_0 : i32, i32, i32
  }
}

</mosaic_0001>

<bundles_post_ra>
// kernel: tpu_custom_call.1
= control target key start
LH: loop header
LB: loop body
LE: loop exit
PB: predicated region body
PF: predicated region fallthrough
CT: control target
= control target key end

     0   :  { %9 = vsyncpa [#allocation3], 0  ;;  %s1086_s0 = inlined_call_operand.hbm [shape: f32[2,8,128], index: 0, kind: input, shape index: {}]   ;;  %s1087_s1 = inlined_call_operand.hbm [shape: f32[2,8,8], index: 1, kind: input, shape index: {}]   ;;  %s1088_s2 = inlined_call_operand.hbm [shape: f32[2,128,128], index: 2, kind: input, shape index: {}]   ;;  %s1089_s3 = inlined_call_operand.vmem [shape: f32[2,1,128], index: 3, kind: input, shape index: {}]   ;;  %s1090_s4 = inlined_call_operand.hbm [shape: f32[2,8,128], index: 4, kind: output, shape index: {}]  }
   0x1   :  { %10 = vsyncpa [#allocation6], 0 }
   0x2   :  { %11 = vsyncpa [#allocation4], 0  ;;  %s838_s15 = smov [#allocation5]   ;;  %s839_s17 = smov [#allocation2]  }
   0x3   :  { %s29_s16 = sshll.u32 %s838_s15, 4  ;;  %s17_s18 = sshll.u32 %s839_s17, 4  ;;  %s30_s16 = int_to_ptr.vmem [resolvable:$true] %s29_s16  ;;  %s877_s18 = int_to_ptr.vmem [resolvable:$true] %s17_s18 }
   0x4   :  { %s744_s21 = scalar_lea.hbm %s1087_s1, 256 }
   0x5   :  { %p745_p0 = scmp.ne.s32.totalorder %s1087_s1, %s744_s21  ;;  %p748_p1 = scmp.lt.u32.totalorder %s744_s21, %s1087_s1 }
   0x7   :  { %p750_p2 = pnand %p748_p1, %p745_p0 }
   0x9   :  { %753 = shalt.err (!%p750_p2)
}
   0xa   :  { %s754_s26 = scalar_lea.vmem %s30_s16, 256  ;;  %p759_p4 = scmp.lt.s32.totalorder %s30_s16, %s30_s16 }
   0xb   :  { %p755_p3 = scmp.ne.s32.totalorder %s30_s16, %s754_s26  ;;  %p760_p5 = scmp.lt.s32.totalorder %s754_s26, %s754_s26 }
   0xd   :  { %p761_p6 = por %p760_p5, %p759_p4 }
   0xf   :  { %p762_p7 = pnand %p761_p6, %p755_p3 }
  0x11   :  { %765 = shalt.err (!%p762_p7)
}
  0x12   :  { %s840_s27 = smov 128   ;;  %s841_s28 = smov 8  }
  0x13   :  { %35 = dma.hbm_to_vmem [thread:$0]  %s1087_s1, 256, %s30_s16, [#allocation6], %s840_s27, %s840_s27, %s841_s28  }
  0x14   :  { %s766_s7 = scalar_lea.hbm %s1086_s0, 256 }
  0x15   :  { %p767_p8 = scmp.ne.s32.totalorder %s1086_s0, %s766_s7  ;;  %p770_p9 = scmp.lt.u32.totalorder %s766_s7, %s1086_s0 }
  0x17   :  { %p772_p10 = pnand %p770_p9, %p767_p8 }
  0x19   :  { %775 = shalt.err (!%p772_p10)
}
  0x1a   :  { %s776_s12 = scalar_lea.vmem %s877_s18, 256  ;;  %p781_p12 = scmp.lt.s32.totalorder %s877_s18, %s877_s18 }
  0x1b   :  { %p777_p11 = scmp.ne.s32.totalorder %s877_s18, %s776_s12  ;;  %p782_p13 = scmp.lt.s32.totalorder %s776_s12, %s776_s12 }
  0x1d   :  { %p783_p0 = por %p782_p13, %p781_p12 }
  0x1f   :  { %p784_p1 = pnand %p783_p0, %p777_p11 }
  0x21   :  { %787 = shalt.err (!%p784_p1)
}
  0x22   :  { %23 = dma.hbm_to_vmem [thread:$0]  %s1086_s0, 256, %s877_s18, [#allocation3], %s840_s27, %s840_s27, %s841_s28  }
  0x23   :  { %s842_s14 = smov [#allocation7]   ;;  %s788_s19 = scalar_lea.hbm %s1088_s2, 4096 }
  0x24   :  { %s41_s15 = sshll.u32 %s842_s14, 4  ;;  %p789_p2 = scmp.ne.s32.totalorder %s1088_s2, %s788_s19  ;;  %s42_s15 = int_to_ptr.vmem [resolvable:$true] %s41_s15 }
  0x25   :  { %p792_p3 = scmp.lt.u32.totalorder %s788_s19, %s1088_s2 }
  0x27   :  { %p794_p4 = pnand %p792_p3, %p789_p2 }
  0x29   :  { %797 = shalt.err (!%p794_p4)
}
  0x2a   :  { %s798_s24 = scalar_lea.vmem %s42_s15, 4096  ;;  %p803_p6 = scmp.lt.s32.totalorder %s42_s15, %s42_s15 }
  0x2b   :  { %p799_p5 = scmp.ne.s32.totalorder %s42_s15, %s798_s24  ;;  %p804_p7 = scmp.lt.s32.totalorder %s798_s24, %s798_s24 }
  0x2d   :  { %p805_p8 = por %p804_p7, %p803_p6 }
  0x2f   :  { %p806_p9 = pnand %p805_p8, %p799_p5 }
  0x31   :  { %809 = shalt.err (!%p806_p9)
}
  0x32   :  { %47 = dma.hbm_to_vmem [thread:$0]  %s1088_s2, 4096, %s42_s15, [#allocation6], %s840_s27, %s840_s27, %s841_s28  }
  0x33   :  { %832 = dma.done.wait [#allocation3], 256  }
  0x34   :  { %833 = vsyncadd [#allocation3], 4294967040 }
  0x35   :  { %834 = dma.done.wait [#allocation6], 4352  }
  0x36   :  { %835 = vsyncadd [#allocation6], 4294962944  ;;  %v843_v0 = vmov 0   ;;  %v63_v1 = vld [vmem:[#allocation7] sm:$0xff]  ;;  %v64_v2 = vld [vmem:[#allocation7 + $0x8] sm:$0xff]  ;;  %v844_v18 = vmov 1  }
  0x37   :  { %732 = vset.pattern.permute.xlu1 %v843_v0  ;;  %730 = vset.pattern.permute.xlu0 %v843_v0  ;;  %v65_v3 = vld [vmem:[#allocation7 + $0x10] sm:$0xff]  ;;  %v652_v4 = vpack.c.bf16 %v64_v2, %v63_v1  ;;  %v66_v5 = vld [vmem:[#allocation7 + $0x18] sm:$0xff]  ;;  %v67_v7 = vld [vmem:[#allocation7 + $0x20] sm:$0xff]  ;;  %v845_v22 = vmov 2   ;;  %v846_v27 = vmov 3   ;;  %v847_v30 = vmov 4  }
  0x38   :  { %v656_v6 = vpack.c.bf16 %v66_v5, %v65_v3  ;;  %v68_v8 = vld [vmem:[#allocation7 + $0x28] sm:$0xff]  ;;  %v69_v10 = vld [vmem:[#allocation7 + $0x30] sm:$0xff]  ;;  %v929_v11 = vld [vmem:[#allocation2] sm:$0xff]  ;;  %v848_v32 = vmov 5   ;;  %v849_v34 = vmov 7   ;;  %v850_v38 = vmov 6  }
  0x39   :  { %653 = vmatprep.subr.bf16.mxu0 %v652_v4  ;;  %v660_v9 = vpack.c.bf16 %v68_v8, %v67_v7  ;;  %v70_v12 = vld [vmem:[#allocation7 + $0x38] sm:$0xff]  ;;  %614 = vmatprep.mubr.f32.mxu0 %v929_v11  ;;  %v934_v14 = vld [vmem:[#allocation5] sm:$0xff]  ;;  %v71_v16 = vld [vmem:[#allocation7 + $0x40] sm:$0xff]  ;;  %v171_v3 = vlaneseq }
  0x3a   :  { %655 = vmatpush3.bf16.msra.mxu0 %v652_v4  ;;  %v932_v13 = vld [vmem:[#allocation5 + $0x8] sm:$0xff]  ;;  %163 = vperm.xlu0 %730, %v934_v14   ;;  %v664_v15 = vpack.c.bf16 %v70_v12, %v69_v10  ;;  %v72_v17 = vld [vmem:[#allocation7 + $0x48] sm:$0xff]  ;;  %v73_v20 = vld [vmem:[#allocation7 + $0x50] sm:$0xff] }
  0x3b   :  { %657 = vmatprep.subr.bf16.mxu0 %v656_v6  ;;  %168 = vperm.xlu1 %732, %v932_v13   ;;  %v668_v19 = vpack.c.bf16 %v72_v17, %v71_v16  ;;  %v74_v21 = vld [vmem:[#allocation7 + $0x58] sm:$0xff]  ;;  %v75_v24 = vld [vmem:[#allocation7 + $0x60] sm:$0xff]  ;;  %v76_v25 = vld [vmem:[#allocation7 + $0x68] sm:$0xff]  ;;  %v172_v5 = vshrl.u32 %v171_v3, 7 }
  0x3c   :  { %v672_v23 = vpack.c.bf16 %v74_v21, %v73_v20  ;;  %v676_v26 = vpack.c.bf16 %v76_v25, %v75_v24  ;;  %v77_v28 = vld [vmem:[#allocation7 + $0x70] sm:$0xff]  ;;  %v78_v29 = vld [vmem:[#allocation7 + $0x78] sm:$0xff]  ;;  %v947_v33 = vld [vmem:[#allocation2 + $0x8] sm:$0xff] }
  0x3d   :  { %v680_v31 = vpack.c.bf16 %v78_v29, %v77_v28  ;;  %v326_v35 = vld [vmem:[#allocation7 + $0x80] sm:$0xff]  ;;  %v327_v36 = vld [vmem:[#allocation7 + $0x88] sm:$0xff]  ;;  %v328_v39 = vld [vmem:[#allocation7 + $0x90] sm:$0xff]  ;;  %v980_v10 = vsub.s32 1, %v172_v5  ;;  %v982_v12 = vsub.s32 2, %v172_v5  ;;  %v986_v17 = vsub.s32 4, %v172_v5 }
  0x3e   :  { %659 = vmatpush3.bf16.msra.mxu0 %v656_v6  ;;  %731 = vset.pattern.permute.xlu0 %v844_v18  ;;  %v684_v37 = vpack.c.bf16 %v327_v36, %v326_v35  ;;  %v329_v40 = vld [vmem:[#allocation7 + $0x98] sm:$0xff]  ;;  %v330_v42 = vld [vmem:[#allocation7 + $0xa0] sm:$0xff]  ;;  %v331_v43 = vld [vmem:[#allocation7 + $0xa8] sm:$0xff] }
  0x3f   :  { %661 = vmatprep.subr.bf16.mxu0 %v660_v9  ;;  %733 = vset.pattern.permute.xlu1 %v844_v18  ;;  %v688_v41 = vpack.c.bf16 %v329_v40, %v328_v39  ;;  %v692_v44 = vpack.c.bf16 %v331_v43, %v330_v42  ;;  %v332_v45 = vld [vmem:[#allocation7 + $0xb0] sm:$0xff]  ;;  %v333_v46 = vld [vmem:[#allocation7 + $0xb8] sm:$0xff]  ;;  %v334_v48 = vld [vmem:[#allocation7 + $0xc0] sm:$0xff] }
  0x40   :  { %186 = vperm.xlu1 %733, %v932_v13   ;;  %182 = vperm.xlu0 %731, %v934_v14   ;;  %v696_v47 = vpack.c.bf16 %v333_v46, %v332_v45  ;;  %v335_v49 = vld [vmem:[#allocation7 + $0xc8] sm:$0xff]  ;;  %v336_v51 = vld [vmem:[#allocation7 + $0xd0] sm:$0xff]  ;;  %v337_v52 = vld [vmem:[#allocation7 + $0xd8] sm:$0xff] }
  0x41   :  { %685 = vmatprep.subr.bf16.mxu1 %v684_v37  ;;  %v700_v50 = vpack.c.bf16 %v335_v49, %v334_v48  ;;  %v704_v53 = vpack.c.bf16 %v337_v52, %v336_v51  ;;  %v338_v54 = vld [vmem:[#allocation7 + $0xe0] sm:$0xff]  ;;  %v339_v55 = vld [vmem:[#allocation7 + $0xe8] sm:$0xff]  ;;  %v340_v57 = vld [vmem:[#allocation7 + $0xf0] sm:$0xff] }
  0x42   :  { %663 = vmatpush3.bf16.msra.mxu0 %v660_v9  ;;  %687 = vmatpush3.bf16.msra.mxu1 %v684_v37  ;;  %v708_v56 = vpack.c.bf16 %v339_v55, %v338_v54  ;;  %v341_v58 = vld [vmem:[#allocation7 + $0xf8] sm:$0xff]  ;;  %v543_v7 = vld [vmem:[%s1089_s3] ss:$0 sm:$0xff]  ;;  %v978_v9 = vsub.s32 0, %v172_v5 }
  0x43   :  { %665 = vmatprep.subr.bf16.mxu0 %v664_v15  ;;  %689 = vmatprep.subr.bf16.mxu1 %v688_v41  ;;  %v712_v59 = vpack.c.bf16 %v341_v58, %v340_v57 }
  0x44   :  { %734 = vset.pattern.permute.xlu1 %v845_v22  ;;  %735 = vset.pattern.permute.xlu0 %v845_v22 }
  0x45   :  { %202 = vperm.xlu1 %734, %v934_v14   ;;  %206 = vperm.xlu0 %735, %v932_v13  }
  0x46   :  { %667 = vmatpush3.bf16.msra.mxu0 %v664_v15  ;;  %691 = vmatpush3.bf16.msra.mxu1 %v688_v41 }
  0x47   :  { %669 = vmatprep.subr.bf16.mxu0 %v668_v19  ;;  %693 = vmatprep.subr.bf16.mxu1 %v692_v44 }
  0x49   :  { %736 = vset.pattern.permute.xlu1 %v846_v27  ;;  %737 = vset.pattern.permute.xlu0 %v847_v30 }
  0x4a   :  { %671 = vmatpush3.bf16.msra.mxu0 %v668_v19  ;;  %222 = vperm.xlu1 %736, %v934_v14  }
  0x4b   :  { %673 = vmatprep.subr.bf16.mxu0 %v672_v23  ;;  %242 = vperm.xlu0 %737, %v934_v14  }
  0x4c   :  { %695 = vmatpush3.bf16.msra.mxu1 %v692_v44  ;;  %v1015_v44 = vsub.s32 7, %v172_v5 }
  0x4d   :  { %697 = vmatprep.subr.bf16.mxu1 %v696_v47 }
  0x4e   :  { %675 = vmatpush3.bf16.msra.mxu0 %v672_v23  ;;  %226 = vperm.xlu1 %736, %v932_v13   ;;  %v993_v23 = vsub.s32 5, %v172_v5 }
  0x4f   :  { %677 = vmatprep.subr.bf16.mxu0 %v676_v26  ;;  %740 = vset.pattern.permute.xlu0 %v848_v32 }
  0x50   :  { %266 = vperm.xlu0 %740, %v932_v13   ;;  %699 = vmatpush3.bf16.msra.mxu1 %v696_v47 }
  0x51   :  { %701 = vmatprep.subr.bf16.mxu1 %v700_v50 }
  0x52   :  { %679 = vmatpush3.bf16.msra.mxu0 %v676_v26  ;;  %738 = vset.pattern.permute.xlu1 %v847_v30  ;;  %v1002_v30 = vsub.s32 6, %v172_v5 }
  0x53   :  { %681 = vmatprep.subr.bf16.mxu0 %v680_v31  ;;  %246 = vperm.xlu1 %738, %v932_v13  }
  0x54   :  { %742 = vset.pattern.permute.xlu0 %v849_v34  ;;  %703 = vmatpush3.bf16.msra.mxu1 %v700_v50 }
  0x55   :  { %302 = vperm.xlu0 %742, %v934_v14   ;;  %705 = vmatprep.subr.bf16.mxu1 %v704_v53 }
  0x56   :  { %683 = vmatpush3.bf16.msra.mxu0 %v680_v31 }
  0x57   :  { %739 = vset.pattern.permute.xlu1 %v848_v32 }
  0x58   :  { %262 = vperm.xlu1 %739, %v934_v14   ;;  %707 = vmatpush3.bf16.msra.mxu1 %v704_v53 }
  0x59   :  { %615 = vmatmul.mubr.f32.vlgmr.msra.gmra.mrb[0].mxu0 %v947_v33  ;;  %709 = vmatprep.subr.bf16.mxu1 %v708_v56 }
  0x5c   :  { %741 = vset.pattern.permute.xlu1 %v850_v38  ;;  %711 = vmatpush3.bf16.msra.mxu1 %v708_v56 }
  0x5d   :  { %282 = vperm.xlu1 %741, %v934_v14   ;;  %713 = vmatprep.subr.bf16.mxu1 %v712_v59  ;;  %v984_v14 = vsub.s32 3, %v172_v5 }
  0x60   :  { %715 = vmatpush3.bf16.msra.mxu1 %v712_v59 }
  0x61   :  { %286 = vperm.xlu1 %741, %v932_v13  }
  0x65   :  { %743 = vset.pattern.permute.xlu1 %v849_v34 }
  0x66   :  { %306 = vperm.xlu1 %743, %v932_v13  }
  0xb9   :  { %v965_v1 = vpop.permute.xlu0 %163 }
  0xba   :  { %v955_v60 = vpop.permute.xlu1 %168 }
  0xbf   :  { %v957_v61 = vpop.permute.xlu1 %186  ;;  %v969_v4 = vpop.permute.xlu0 %182 }
  0xc4   :  { %v959_v62 = vpop.permute.xlu1 %202  ;;  %v976_v8 = vpop.permute.xlu0 %206 }
  0xc9   :  { %v961_v63 = vpop.permute.xlu1 %222 }
  0xca   :  { %v996_v25 = vpop.permute.xlu0 %242 }
  0xcd   :  { %v963_v0 = vpop.permute.xlu1 %226 }
  0xcf   :  { %v1018_v46 = vpop.permute.xlu0 %266 }
  0xd2   :  { %v967_v2 = vpop.permute.xlu1 %246 }
  0xd7   :  { %v971_v6 = vpop.permute.xlu1 %262 }
  0xdc   :  { %v988_v18 = vpop.permute.xlu1 %282 }
  0xe0   :  { %v1009_v38 = vpop.permute.xlu1 %286 }
  0xe5   :  { %v1027_v59 = vpop.permute.xlu1 %306 }
 0x12c   :  { %v616_v13 = vpop.f32.mrb[0].mxu0 }
 0x12d   :  { %v158_v15 = vadd.f32 %v616_v13, %v543_v7  ;;  %v152_v16 = vpop.f32.mrb[1].mxu0 }
 0x12e   :  { %v153_v22 = vadd.f32 %v543_v7, %v152_v16 }
 0x12f   :  { %v178_v19 = vrot.slane %v158_v15, %v978_v9  ;;  %v196_v20 = vrot.slane %v158_v15, %v980_v10  ;;  %v216_v21 = vrot.slane %v158_v15, %v982_v12  ;;  %v236_v24 = vrot.slane %v158_v15, %v984_v14 }
 0x130   :  { %v256_v29 = vrot.slane %v158_v15, %v986_v17  ;;  %v174_v32 = vrot.slane %v153_v22, %v978_v9  ;;  %v192_v34 = vrot.slane %v153_v22, %v980_v10  ;;  %v212_v35 = vrot.slane %v153_v22, %v982_v12 }
 0x131   :  { %v180_v26 = vmul.f32 %v178_v19, %v955_v60  ;;  %v198_v27 = vmul.f32 %v196_v20, %v957_v61  ;;  %v218_v28 = vmul.f32 %v216_v21, %v976_v8  ;;  %v238_v36 = vmul.f32 %v236_v24, %v963_v0  ;;  %v303_v24 = vpop.permute.xlu0 %302 }
 0x132   :  { %v276_v37 = vrot.slane %v158_v15, %v993_v23  ;;  %v179_v40 = vmul.f32 %v174_v32, %v965_v1  ;;  %v197_v41 = vmul.f32 %v192_v34, %v969_v4  ;;  %v232_v42 = vrot.slane %v153_v22, %v984_v14 }
 0x133   :  { %v200_v31 = vadd.f32 %v198_v27, %v180_v26  ;;  %v258_v43 = vmul.f32 %v256_v29, %v967_v2  ;;  %v296_v45 = vrot.slane %v158_v15, %v1002_v30  ;;  %v217_v49 = vmul.f32 %v212_v35, %v959_v62 }
 0x134   :  { %v199_v48 = vadd.f32 %v197_v41, %v179_v40  ;;  %v252_v50 = vrot.slane %v153_v22, %v986_v17  ;;  %v278_v51 = vmul.f32 %v276_v37, %v1018_v46  ;;  %v237_v54 = vmul.f32 %v232_v42, %v961_v63 }
 0x135   :  { %v220_v39 = vadd.f32 %v218_v28, %v200_v31  ;;  %v272_v55 = vrot.slane %v153_v22, %v993_v23  ;;  %v298_v56 = vmul.f32 %v296_v45, %v1009_v38  ;;  %v316_v57 = vrot.slane %v158_v15, %v1015_v44 }
 0x136   :  { %v219_v53 = vadd.f32 %v217_v49, %v199_v48  ;;  %v257_v5 = vmul.f32 %v252_v50, %v996_v25  ;;  %v292_v7 = vrot.slane %v153_v22, %v1002_v30  ;;  %v312_v20 = vrot.slane %v153_v22, %v1015_v44  ;;  %v545_v22 = vld [vmem:[%s1089_s3 + $0x1] ss:$0 sm:$0xff]  ;;  %s851_s3 = smov [#allocation8]  }
 0x137   :  { %v240_v47 = vadd.f32 %v238_v36, %v220_v39  ;;  %v277_v19 = vmul.f32 %v272_v55, %v971_v6  ;;  %v318_v21 = vmul.f32 %v316_v57, %v1027_v59  ;;  %s530_s30 = sshll.u32 %s851_s3, 4  ;;  %s531_s30 = int_to_ptr.vmem [resolvable:$true] %s530_s30 }
 0x138   :  { %v239_v3 = vadd.f32 %v237_v54, %v219_v53  ;;  %v297_v15 = vmul.f32 %v292_v7, %v988_v18  ;;  %v317_v29 = vmul.f32 %v312_v20, %v303_v24  ;;  %s810_s5 = scalar_lea.vmem %s531_s30, 256  ;;  %p815_p11 = scmp.lt.s32.totalorder %s531_s30, %s531_s30 }
 0x139   :  { %v260_v52 = vadd.f32 %v258_v43, %v240_v47  ;;  %p811_p10 = scmp.ne.s32.totalorder %s531_s30, %s810_s5  ;;  %p816_p12 = scmp.lt.s32.totalorder %s810_s5, %s810_s5 }
 0x13a   :  { %v259_v16 = vadd.f32 %v257_v5, %v239_v3 }
 0x13b   :  { %v280_v58 = vadd.f32 %v278_v51, %v260_v52  ;;  %p817_p13 = por %p816_p12, %p815_p11 }
 0x13c   :  { %v279_v26 = vadd.f32 %v277_v19, %v259_v16 }
 0x13d   :  { %v300_v13 = vadd.f32 %v298_v56, %v280_v58  ;;  %p818_p0 = pnand %p817_p13, %p811_p10 }
 0x13e   :  { %v299_v28 = vadd.f32 %v297_v15, %v279_v26 }
 0x13f   :  { %v320_v27 = vadd.f32 %v318_v21, %v300_v13 }
 0x140   :  { %v319_v31 = vadd.f32 %v317_v29, %v299_v28 }
 0x141   :  { %v322_v32 = vmax.f32 %v320_v27, 0.0 }
 0x142   :  { %v321_v34 = vmax.f32 %v319_v31, 0.0 }
 0x143   :  { %v324_v36 = vadd.f32 %v322_v32, %v947_v33 }
 0x144   :  { %v323_v35 = vadd.f32 %v321_v34, %v929_v11 }
 0x146   :  { %649 = vmatprep.mubr.f32.mxu1 %v323_v35 }
 0x147   :  { %650 = vmatmul.mubr.f32.vlgmr.msra.gmra.mrb[0].mxu1 %v324_v36 }
 0x21a   :  { %v651_v37 = vpop.f32.mrb[0].mxu1 }
 0x21b   :  { %v422_v39 = vadd.f32 %v651_v37, %v545_v22  ;;  %v416_v40 = vpop.f32.mrb[1].mxu1 }
 0x21c   :  { %v417_v41 = vadd.f32 %v545_v22, %v416_v40 }
 0x21d   :  { %v432_v42 = vrot.slane %v422_v39, %v978_v9  ;;  %v442_v43 = vrot.slane %v422_v39, %v980_v10  ;;  %v454_v45 = vrot.slane %v422_v39, %v982_v12  ;;  %v466_v50 = vrot.slane %v422_v39, %v984_v14 }
 0x21e   :  { %v428_v11 = vrot.slane %v417_v41, %v978_v9  ;;  %v438_v33 = vrot.slane %v417_v41, %v980_v10  ;;  %v450_v47 = vrot.slane %v417_v41, %v982_v12  ;;  %v462_v53 = vrot.slane %v417_v41, %v984_v14 }
 0x21f   :  { %v434_v48 = vmul.f32 %v432_v42, %v955_v60  ;;  %v444_v49 = vmul.f32 %v442_v43, %v957_v61  ;;  %v456_v55 = vmul.f32 %v454_v45, %v976_v8  ;;  %v478_v9 = vrot.slane %v422_v39, %v986_v17 }
 0x220   :  { %v433_v51 = vmul.f32 %v428_v11, %v965_v1  ;;  %v443_v52 = vmul.f32 %v438_v33, %v969_v4  ;;  %v455_v12 = vmul.f32 %v450_v47, %v959_v62  ;;  %v474_v60 = vrot.slane %v417_v41, %v986_v17 }
 0x221   :  { %v446_v54 = vadd.f32 %v444_v49, %v434_v48  ;;  %v468_v61 = vmul.f32 %v466_v50, %v963_v0  ;;  %v490_v57 = vrot.slane %v422_v39, %v993_v23  ;;  %v467_v4 = vmul.f32 %v462_v53, %v961_v63 }
 0x222   :  { %v445_v10 = vadd.f32 %v443_v52, %v433_v51  ;;  %v486_v14 = vrot.slane %v417_v41, %v993_v23  ;;  %v480_v8 = vmul.f32 %v478_v9, %v967_v2  ;;  %v502_v3 = vrot.slane %v422_v39, %v1002_v30 }
 0x223   :  { %v458_v56 = vadd.f32 %v456_v55, %v446_v54  ;;  %v479_v62 = vmul.f32 %v474_v60, %v996_v25  ;;  %v498_v17 = vrot.slane %v417_v41, %v1002_v30  ;;  %v492_v0 = vmul.f32 %v490_v57, %v1018_v46 }
 0x224   :  { %v457_v1 = vadd.f32 %v455_v12, %v445_v10  ;;  %v514_v13 = vrot.slane %v422_v39, %v1015_v44  ;;  %v491_v63 = vmul.f32 %v486_v14, %v971_v6  ;;  %v510_v23 = vrot.slane %v417_v41, %v1015_v44 }
 0x225   :  { %v470_v58 = vadd.f32 %v468_v61, %v458_v56  ;;  %v504_v2 = vmul.f32 %v502_v3, %v1009_v38  ;;  %v503_v21 = vmul.f32 %v498_v17, %v988_v18 }
 0x226   :  { %v469_v5 = vadd.f32 %v467_v4, %v457_v1  ;;  %v516_v25 = vmul.f32 %v514_v13, %v1027_v59  ;;  %v515_v15 = vmul.f32 %v510_v23, %v303_v24 }
 0x227   :  { %v482_v7 = vadd.f32 %v480_v8, %v470_v58 }
 0x228   :  { %v481_v16 = vadd.f32 %v479_v62, %v469_v5 }
 0x229   :  { %v494_v19 = vadd.f32 %v492_v0, %v482_v7 }
 0x22a   :  { %v493_v20 = vadd.f32 %v491_v63, %v481_v16 }
 0x22b   :  { %v506_v26 = vadd.f32 %v504_v2, %v494_v19 }
 0x22c   :  { %v505_v30 = vadd.f32 %v503_v21, %v493_v20 }
 0x22d   :  { %v518_v27 = vadd.f32 %v516_v25, %v506_v26 }
 0x22e   :  { %v517_v46 = vadd.f32 %v515_v15, %v505_v30 }
 0x22f   :  { %v520_v28 = vmax.f32 %v518_v27, 0.0 }
 0x230   :  { %v519_v29 = vmax.f32 %v517_v46, 0.0 }
 0x231   :  { %v522_v6 = vadd.f32 %v520_v28, %v324_v36 }
 0x232   :  { %v521_v31 = vadd.f32 %v519_v29, %v323_v35 }
 0x233   :  { %524 = vst [vmem:[#allocation8 + $0x8] sm:$0xff] %v522_v6 }
 0x234   :  { %523 = vst [vmem:[#allocation8] sm:$0xff] %v521_v31 }
 0x235   :  { %821 = shalt.err (!%p818_p0)
}
 0x236   :  { %s822_s8 = scalar_lea.hbm %s1090_s4, 256 }
 0x237   :  { %p823_p1 = scmp.ne.s32.totalorder %s1090_s4, %s822_s8  ;;  %p826_p2 = scmp.lt.u32.totalorder %s822_s8, %s1090_s4 }
 0x239   :  { %p828_p3 = pnand %p826_p2, %p823_p1 }
 0x23b   :  { %831 = shalt.err (!%p828_p3)
}
 0x23c   :  { %536 = dma.vmem_to_hbm [thread:$0]  %s531_s30, 256, %s1090_s4, [#allocation4], %s840_s27, %s840_s27, %s841_s28  }
 0x23d   :  { %836 = dma.done.wait [#allocation4], 256  }
 0x23e   :  { %837 = vsyncadd [#allocation4], 4294967040 }
 0x23f   :  { %540 = vsyncpa [#allocation3], 1 }
 0x240   :  { %541 = vsyncpa [#allocation6], 1 }
 0x241   :  { %542 = vsyncpa [#allocation4], 1 }

// kernel: tpu_custom_call.1
= control target key start
LH: loop header
LB: loop body
LE: loop exit
PB: predicated region body
PF: predicated region fallthrough
CT: control target
= control target key end

     0   :  { %9 = vsyncpa [#allocation3], 0  ;;  %s1086_s0 = inlined_call_operand.hbm [shape: f32[2,8,128], index: 0, kind: input, shape index: {}]   ;;  %s1087_s1 = inlined_call_operand.hbm [shape: f32[2,8,8], index: 1, kind: input, shape index: {}]   ;;  %s1088_s2 = inlined_call_operand.hbm [shape: f32[2,128,128], index: 2, kind: input, shape index: {}]   ;;  %s1089_s3 = inlined_call_operand.vmem [shape: f32[2,1,128], index: 3, kind: input, shape index: {}]   ;;  %s1090_s4 = inlined_call_operand.hbm [shape: f32[2,8,128], index: 4, kind: output, shape index: {}]  }
   0x1   :  { %10 = vsyncpa [#allocation6], 0 }
   0x2   :  { %11 = vsyncpa [#allocation4], 0  ;;  %s838_s15 = smov [#allocation5]   ;;  %s839_s17 = smov [#allocation2]  }
   0x3   :  { %s29_s16 = sshll.u32 %s838_s15, 4  ;;  %s17_s18 = sshll.u32 %s839_s17, 4  ;;  %s30_s16 = int_to_ptr.vmem [resolvable:$true] %s29_s16  ;;  %s877_s18 = int_to_ptr.vmem [resolvable:$true] %s17_s18 }
   0x4   :  { %s744_s21 = scalar_lea.hbm %s1087_s1, 256 }
   0x5   :  { %p745_p0 = scmp.ne.s32.totalorder %s1087_s1, %s744_s21  ;;  %p748_p1 = scmp.lt.u32.totalorder %s744_s21, %s1087_s1 }
   0x7   :  { %p750_p2 = pnand %p748_p1, %p745_p0 }
   0x9   :  { %753 = shalt.err (!%p750_p2)
}
   0xa   :  { %s754_s26 = scalar_lea.vmem %s30_s16, 256  ;;  %p759_p4 = scmp.lt.s32.totalorder %s30_s16, %s30_s16 }
   0xb   :  { %p755_p3 = scmp.ne.s32.totalorder %s30_s16, %s754_s26  ;;  %p760_p5 = scmp.lt.s32.totalorder %s754_s26, %s754_s26 }
   0xd   :  { %p761_p6 = por %p760_p5, %p759_p4 }
   0xf   :  { %p762_p7 = pnand %p761_p6, %p755_p3 }
  0x11   :  { %765 = shalt.err (!%p762_p7)
}
  0x12   :  { %s840_s27 = smov 128   ;;  %s841_s28 = smov 8  }
  0x13   :  { %35 = dma.hbm_to_vmem [thread:$0]  %s1087_s1, 256, %s30_s16, [#allocation6], %s840_s27, %s840_s27, %s841_s28  }
  0x14   :  { %s766_s7 = scalar_lea.hbm %s1086_s0, 256 }
  0x15   :  { %p767_p8 = scmp.ne.s32.totalorder %s1086_s0, %s766_s7  ;;  %p770_p9 = scmp.lt.u32.totalorder %s766_s7, %s1086_s0 }
  0x17   :  { %p772_p10 = pnand %p770_p9, %p767_p8 }
  0x19   :  { %775 = shalt.err (!%p772_p10)
}
  0x1a   :  { %s776_s12 = scalar_lea.vmem %s877_s18, 256  ;;  %p781_p12 = scmp.lt.s32.totalorder %s877_s18, %s877_s18 }
  0x1b   :  { %p777_p11 = scmp.ne.s32.totalorder %s877_s18, %s776_s12  ;;  %p782_p13 = scmp.lt.s32.totalorder %s776_s12, %s776_s12 }
  0x1d   :  { %p783_p0 = por %p782_p13, %p781_p12 }
  0x1f   :  { %p784_p1 = pnand %p783_p0, %p777_p11 }
  0x21   :  { %787 = shalt.err (!%p784_p1)
}
  0x22   :  { %23 = dma.hbm_to_vmem [thread:$0]  %s1086_s0, 256, %s877_s18, [#allocation3], %s840_s27, %s840_s27, %s841_s28  }
  0x23   :  { %s842_s14 = smov [#allocation7]   ;;  %s788_s19 = scalar_lea.hbm %s1088_s2, 4096 }
  0x24   :  { %s41_s15 = sshll.u32 %s842_s14, 4  ;;  %p789_p2 = scmp.ne.s32.totalorder %s1088_s2, %s788_s19  ;;  %s42_s15 = int_to_ptr.vmem [resolvable:$true] %s41_s15 }
  0x25   :  { %p792_p3 = scmp.lt.u32.totalorder %s788_s19, %s1088_s2 }
  0x27   :  { %p794_p4 = pnand %p792_p3, %p789_p2 }
  0x29   :  { %797 = shalt.err (!%p794_p4)
}
  0x2a   :  { %s798_s24 = scalar_lea.vmem %s42_s15, 4096  ;;  %p803_p6 = scmp.lt.s32.totalorder %s42_s15, %s42_s15 }
  0x2b   :  { %p799_p5 = scmp.ne.s32.totalorder %s42_s15, %s798_s24  ;;  %p804_p7 = scmp.lt.s32.totalorder %s798_s24, %s798_s24 }
  0x2d   :  { %p805_p8 = por %p804_p7, %p803_p6 }
  0x2f   :  { %p806_p9 = pnand %p805_p8, %p799_p5 }
  0x31   :  { %809 = shalt.err (!%p806_p9)
}
  0x32   :  { %47 = dma.hbm_to_vmem [thread:$0]  %s1088_s2, 4096, %s42_s15, [#allocation6], %s840_s27, %s840_s27, %s841_s28  }
  0x33   :  { %832 = dma.done.wait [#allocation3], 256  }
  0x34   :  { %833 = vsyncadd [#allocation3], 4294967040 }
  0x35   :  { %834 = dma.done.wait [#allocation6], 4352  }
  0x36   :  { %835 = vsyncadd [#allocation6], 4294962944  ;;  %v843_v0 = vmov 0   ;;  %v63_v1 = vld [vmem:[#allocation7] sm:$0xff]  ;;  %v64_v2 = vld [vmem:[#allocation7 + $0x8] sm:$0xff]  ;;  %v844_v18 = vmov 1  }
  0x37   :  { %732 = vset.pattern.permute.xlu1 %v843_v0  ;;  %730 = vset.pattern.permute.xlu0 %v843_v0  ;;  %v65_v3 = vld [vmem:[#allocation7 + $0x10] sm:$0xff]  ;;  %v652_v4 = vpack.c.bf16 %v64_v2, %v63_v1  ;;  %v66_v5 = vld [vmem:[#allocation7 + $0x18] sm:$0xff]  ;;  %v67_v7 = vld [vmem:[#allocation7 + $0x20] sm:$0xff]  ;;  %v845_v22 = vmov 2   ;;  %v846_v27 = vmov 3   ;;  %v847_v30 = vmov 4  }
  0x38   :  { %v656_v6 = vpack.c.bf16 %v66_v5, %v65_v3  ;;  %v68_v8 = vld [vmem:[#allocation7 + $0x28] sm:$0xff]  ;;  %v69_v10 = vld [vmem:[#allocation7 + $0x30] sm:$0xff]  ;;  %v929_v11 = vld [vmem:[#allocation2] sm:$0xff]  ;;  %v848_v32 = vmov 5   ;;  %v849_v34 = vmov 7   ;;  %v850_v38 = vmov 6  }
  0x39   :  { %653 = vmatprep.subr.bf16.mxu0 %v652_v4  ;;  %v660_v9 = vpack.c.bf16 %v68_v8, %v67_v7  ;;  %v70_v12 = vld [vmem:[#allocation7 + $0x38] sm:$0xff]  ;;  %614 = vmatprep.mubr.f32.mxu0 %v929_v11  ;;  %v934_v14 = vld [vmem:[#allocation5] sm:$0xff]  ;;  %v71_v16 = vld [vmem:[#allocation7 + $0x40] sm:$0xff]  ;;  %v171_v3 = vlaneseq }
  0x3a   :  { %655 = vmatpush3.bf16.msra.mxu0 %v652_v4  ;;  %v932_v13 = vld [vmem:[#allocation5 + $0x8] sm:$0xff]  ;;  %163 = vperm.xlu0 %730, %v934_v14   ;;  %v664_v15 = vpack.c.bf16 %v70_v12, %v69_v10  ;;  %v72_v17 = vld [vmem:[#allocation7 + $0x48] sm:$0xff]  ;;  %v73_v20 = vld [vmem:[#allocation7 + $0x50] sm:$0xff] }
  0x3b   :  { %657 = vmatprep.subr.bf16.mxu0 %v656_v6  ;;  %168 = vperm.xlu1 %732, %v932_v13   ;;  %v668_v19 = vpack.c.bf16 %v72_v17, %v71_v16  ;;  %v74_v21 = vld [vmem:[#allocation7 + $0x58] sm:$0xff]  ;;  %v75_v24 = vld [vmem:[#allocation7 + $0x60] sm:$0xff]  ;;  %v76_v25 = vld [vmem:[#allocation7 + $0x68] sm:$0xff]  ;;  %v172_v5 = vshrl.u32 %v171_v3, 7 }
  0x3c   :  { %v672_v23 = vpack.c.bf16 %v74_v21, %v73_v20  ;;  %v676_v26 = vpack.c.bf16 %v76_v25, %v75_v24  ;;  %v77_v28 = vld [vmem:[#allocation7 + $0x70] sm:$0xff]  ;;  %v78_v29 = vld [vmem:[#allocation7 + $0x78] sm:$0xff]  ;;  %v947_v33 = vld [vmem:[#allocation2 + $0x8] sm:$0xff] }
  0x3d   :  { %v680_v31 = vpack.c.bf16 %v78_v29, %v77_v28  ;;  %v326_v35 = vld [vmem:[#allocation7 + $0x80] sm:$0xff]  ;;  %v327_v36 = vld [vmem:[#allocation7 + $0x88] sm:$0xff]  ;;  %v328_v39 = vld [vmem:[#allocation7 + $0x90] sm:$0xff]  ;;  %v980_v10 = vsub.s32 1, %v172_v5  ;;  %v982_v12 = vsub.s32 2, %v172_v5  ;;  %v986_v17 = vsub.s32 4, %v172_v5 }
  0x3e   :  { %659 = vmatpush3.bf16.msra.mxu0 %v656_v6  ;;  %731 = vset.pattern.permute.xlu0 %v844_v18  ;;  %v684_v37 = vpack.c.bf16 %v327_v36, %v326_v35  ;;  %v329_v40 = vld [vmem:[#allocation7 + $0x98] sm:$0xff]  ;;  %v330_v42 = vld [vmem:[#allocation7 + $0xa0] sm:$0xff]  ;;  %v331_v43 = vld [vmem:[#allocation7 + $0xa8] sm:$0xff] }
  0x3f   :  { %661 = vmatprep.subr.bf16.mxu0 %v660_v9  ;;  %733 = vset.pattern.permute.xlu1 %v844_v18  ;;  %v688_v41 = vpack.c.bf16 %v329_v40, %v328_v39  ;;  %v692_v44 = vpack.c.bf16 %v331_v43, %v330_v42  ;;  %v332_v45 = vld [vmem:[#allocation7 + $0xb0] sm:$0xff]  ;;  %v333_v46 = vld [vmem:[#allocation7 + $0xb8] sm:$0xff]  ;;  %v334_v48 = vld [vmem:[#allocation7 + $0xc0] sm:$0xff] }
  0x40   :  { %186 = vperm.xlu1 %733, %v932_v13   ;;  %182 = vperm.xlu0 %731, %v934_v14   ;;  %v696_v47 = vpack.c.bf16 %v333_v46, %v332_v45  ;;  %v335_v49 = vld [vmem:[#allocation7 + $0xc8] sm:$0xff]  ;;  %v336_v51 = vld [vmem:[#allocation7 + $0xd0] sm:$0xff]  ;;  %v337_v52 = vld [vmem:[#allocation7 + $0xd8] sm:$0xff] }
  0x41   :  { %685 = vmatprep.subr.bf16.mxu1 %v684_v37  ;;  %v700_v50 = vpack.c.bf16 %v335_v49, %v334_v48  ;;  %v704_v53 = vpack.c.bf16 %v337_v52, %v336_v51  ;;  %v338_v54 = vld [vmem:[#allocation7 + $0xe0] sm:$0xff]  ;;  %v339_v55 = vld [vmem:[#allocation7 + $0xe8] sm:$0xff]  ;;  %v340_v57 = vld [vmem:[#allocation7 + $0xf0] sm:$0xff] }
  0x42   :  { %663 = vmatpush3.bf16.msra.mxu0 %v660_v9  ;;  %687 = vmatpush3.bf16.msra.mxu1 %v684_v37  ;;  %v708_v56 = vpack.c.bf16 %v339_v55, %v338_v54  ;;  %v341_v58 = vld [vmem:[#allocation7 + $0xf8] sm:$0xff]  ;;  %v543_v7 = vld [vmem:[%s1089_s3] ss:$0 sm:$0xff]  ;;  %v978_v9 = vsub.s32 0, %v172_v5 }
  0x43   :  { %665 = vmatprep.subr.bf16.mxu0 %v664_v15  ;;  %689 = vmatprep.subr.bf16.mxu1 %v688_v41  ;;  %v712_v59 = vpack.c.bf16 %v341_v58, %v340_v57 }
  0x44   :  { %734 = vset.pattern.permute.xlu1 %v845_v22  ;;  %735 = vset.pattern.permute.xlu0 %v845_v22 }
  0x45   :  { %202 = vperm.xlu1 %734, %v934_v14   ;;  %206 = vperm.xlu0 %735, %v932_v13  }
  0x46   :  { %667 = vmatpush3.bf16.msra.mxu0 %v664_v15  ;;  %691 = vmatpush3.bf16.msra.mxu1 %v688_v41 }
  0x47   :  { %669 = vmatprep.subr.bf16.mxu0 %v668_v19  ;;  %693 = vmatprep.subr.bf16.mxu1 %v692_v44 }
  0x49   :  { %736 = vset.pattern.permute.xlu1 %v846_v27  ;;  %737 = vset.pattern.permute.xlu0 %v847_v30 }
  0x4a   :  { %671 = vmatpush3.bf16.msra.mxu0 %v668_v19  ;;  %222 = vperm.xlu1 %736, %v934_v14  }
  0x4b   :  { %673 = vmatprep.subr.bf16.mxu0 %v672_v23  ;;  %242 = vperm.xlu0 %737, %v934_v14  }
  0x4c   :  { %695 = vmatpush3.bf16.msra.mxu1 %v692_v44  ;;  %v1015_v44 = vsub.s32 7, %v172_v5 }
  0x4d   :  { %697 = vmatprep.subr.bf16.mxu1 %v696_v47 }
  0x4e   :  { %675 = vmatpush3.bf16.msra.mxu0 %v672_v23  ;;  %226 = vperm.xlu1 %736, %v932_v13   ;;  %v993_v23 = vsub.s32 5, %v172_v5 }
  0x4f   :  { %677 = vmatprep.subr.bf16.mxu0 %v676_v26  ;;  %740 = vset.pattern.permute.xlu0 %v848_v32 }
  0x50   :  { %266 = vperm.xlu0 %740, %v932_v13   ;;  %699 = vmatpush3.bf16.msra.mxu1 %v696_v47 }
  0x51   :  { %701 = vmatprep.subr.bf16.mxu1 %v700_v50 }
  0x52   :  { %679 = vmatpush3.bf16.msra.mxu0 %v676_v26  ;;  %738 = vset.pattern.permute.xlu1 %v847_v30  ;;  %v1002_v30 = vsub.s32 6, %v172_v5 }
  0x53   :  { %681 = vmatprep.subr.bf16.mxu0 %v680_v31  ;;  %246 = vperm.xlu1 %738, %v932_v13  }
  0x54   :  { %742 = vset.pattern.permute.xlu0 %v849_v34  ;;  %703 = vmatpush3.bf16.msra.mxu1 %v700_v50 }
  0x55   :  { %302 = vperm.xlu0 %742, %v934_v14   ;;  %705 = vmatprep.subr.bf16.mxu1 %v704_v53 }
  0x56   :  { %683 = vmatpush3.bf16.msra.mxu0 %v680_v31 }
  0x57   :  { %739 = vset.pattern.permute.xlu1 %v848_v32 }
  0x58   :  { %262 = vperm.xlu1 %739, %v934_v14   ;;  %707 = vmatpush3.bf16.msra.mxu1 %v704_v53 }
  0x59   :  { %615 = vmatmul.mubr.f32.vlgmr.msra.gmra.mrb[0].mxu0 %v947_v33  ;;  %709 = vmatprep.subr.bf16.mxu1 %v708_v56 }
  0x5c   :  { %741 = vset.pattern.permute.xlu1 %v850_v38  ;;  %711 = vmatpush3.bf16.msra.mxu1 %v708_v56 }
  0x5d   :  { %282 = vperm.xlu1 %741, %v934_v14   ;;  %713 = vmatprep.subr.bf16.mxu1 %v712_v59  ;;  %v984_v14 = vsub.s32 3, %v172_v5 }
  0x60   :  { %715 = vmatpush3.bf16.msra.mxu1 %v712_v59 }
  0x61   :  { %286 = vperm.xlu1 %741, %v932_v13  }
  0x65   :  { %743 = vset.pattern.permute.xlu1 %v849_v34 }
  0x66   :  { %306 = vperm.xlu1 %743, %v932_v13  }
  0xb9   :  { %v965_v1 = vpop.permute.xlu0 %163 }
  0xba   :  { %v955_v60 = vpop.permute.xlu1 %168 }
  0xbf   :  { %v957_v61 = vpop.permute.xlu1 %186  ;;  %v969_v4 = vpop.permute.xlu0 %182 }
  0xc4   :  { %v959_v62 = vpop.permute.xlu1 %202  ;;  %v976_v8 = vpop.permute.xlu0 %206 }
  0xc9   :  { %v961_v63 = vpop.permute.xlu1 %222 }
  0xca   :  { %v996_v25 = vpop.permute.xlu0 %242 }
  0xcd   :  { %v963_v0 = vpop.permute.xlu1 %226 }
  0xcf   :  { %v1018_v46 = vpop.permute.xlu0 %266 }
  0xd2   :  { %v967_v2 = vpop.permute.xlu1 %246 }
  0xd7   :  { %v971_v6 = vpop.permute.xlu1 %262 }
  0xdc   :  { %v988_v18 = vpop.permute.xlu1 %282 }
  0xe0   :  { %v1009_v38 = vpop.permute.xlu1 %286 }
  0xe5   :  { %v1027_v59 = vpop.permute.xlu1 %306 }
 0x12c   :  { %v616_v13 = vpop.f32.mrb[0].mxu0 }
 0x12d   :  { %v158_v15 = vadd.f32 %v616_v13, %v543_v7  ;;  %v152_v16 = vpop.f32.mrb[1].mxu0 }
 0x12e   :  { %v153_v22 = vadd.f32 %v543_v7, %v152_v16 }
 0x12f   :  { %v178_v19 = vrot.slane %v158_v15, %v978_v9  ;;  %v196_v20 = vrot.slane %v158_v15, %v980_v10  ;;  %v216_v21 = vrot.slane %v158_v15, %v982_v12  ;;  %v236_v24 = vrot.slane %v158_v15, %v984_v14 }
 0x130   :  { %v256_v29 = vrot.slane %v158_v15, %v986_v17  ;;  %v174_v32 = vrot.slane %v153_v22, %v978_v9  ;;  %v192_v34 = vrot.slane %v153_v22, %v980_v10  ;;  %v212_v35 = vrot.slane %v153_v22, %v982_v12 }
 0x131   :  { %v180_v26 = vmul.f32 %v178_v19, %v955_v60  ;;  %v198_v27 = vmul.f32 %v196_v20, %v957_v61  ;;  %v218_v28 = vmul.f32 %v216_v21, %v976_v8  ;;  %v238_v36 = vmul.f32 %v236_v24, %v963_v0  ;;  %v303_v24 = vpop.permute.xlu0 %302 }
 0x132   :  { %v276_v37 = vrot.slane %v158_v15, %v993_v23  ;;  %v179_v40 = vmul.f32 %v174_v32, %v965_v1  ;;  %v197_v41 = vmul.f32 %v192_v34, %v969_v4  ;;  %v232_v42 = vrot.slane %v153_v22, %v984_v14 }
 0x133   :  { %v200_v31 = vadd.f32 %v198_v27, %v180_v26  ;;  %v258_v43 = vmul.f32 %v256_v29, %v967_v2  ;;  %v296_v45 = vrot.slane %v158_v15, %v1002_v30  ;;  %v217_v49 = vmul.f32 %v212_v35, %v959_v62 }
 0x134   :  { %v199_v48 = vadd.f32 %v197_v41, %v179_v40  ;;  %v252_v50 = vrot.slane %v153_v22, %v986_v17  ;;  %v278_v51 = vmul.f32 %v276_v37, %v1018_v46  ;;  %v237_v54 = vmul.f32 %v232_v42, %v961_v63 }
 0x135   :  { %v220_v39 = vadd.f32 %v218_v28, %v200_v31  ;;  %v272_v55 = vrot.slane %v153_v22, %v993_v23  ;;  %v298_v56 = vmul.f32 %v296_v45, %v1009_v38  ;;  %v316_v57 = vrot.slane %v158_v15, %v1015_v44 }
 0x136   :  { %v219_v53 = vadd.f32 %v217_v49, %v199_v48  ;;  %v257_v5 = vmul.f32 %v252_v50, %v996_v25  ;;  %v292_v7 = vrot.slane %v153_v22, %v1002_v30  ;;  %v312_v20 = vrot.slane %v153_v22, %v1015_v44  ;;  %v545_v22 = vld [vmem:[%s1089_s3 + $0x1] ss:$0 sm:$0xff]  ;;  %s851_s3 = smov [#allocation8]  }
 0x137   :  { %v240_v47 = vadd.f32 %v238_v36, %v220_v39  ;;  %v277_v19 = vmul.f32 %v272_v55, %v971_v6  ;;  %v318_v21 = vmul.f32 %v316_v57, %v1027_v59  ;;  %s530_s30 = sshll.u32 %s851_s3, 4  ;;  %s531_s30 = int_to_ptr.vmem [resolvable:$true] %s530_s30 }
 0x138   :  { %v239_v3 = vadd.f32 %v237_v54, %v219_v53  ;;  %v297_v15 = vmul.f32 %v292_v7, %v988_v18  ;;  %v317_v29 = vmul.f32 %v312_v20, %v303_v24  ;;  %s810_s5 = scalar_lea.vmem %s531_s30, 256  ;;  %p815_p11 = scmp.lt.s32.totalorder %s531_s30, %s531_s30 }
 0x139   :  { %v260_v52 = vadd.f32 %v258_v43, %v240_v47  ;;  %p811_p10 = scmp.ne.s32.totalorder %s531_s30, %s810_s5  ;;  %p816_p12 = scmp.lt.s32.totalorder %s810_s5, %s810_s5 }
 0x13a   :  { %v259_v16 = vadd.f32 %v257_v5, %v239_v3 }
 0x13b   :  { %v280_v58 = vadd.f32 %v278_v51, %v260_v52  ;;  %p817_p13 = por %p816_p12, %p815_p11 }
 0x13c   :  { %v279_v26 = vadd.f32 %v277_v19, %v259_v16 }
 0x13d   :  { %v300_v13 = vadd.f32 %v298_v56, %v280_v58  ;;  %p818_p0 = pnand %p817_p13, %p811_p10 }
 0x13e   :  { %v299_v28 = vadd.f32 %v297_v15, %v279_v26 }
 0x13f   :  { %v320_v27 = vadd.f32 %v318_v21, %v300_v13 }
 0x140   :  { %v319_v31 = vadd.f32 %v317_v29, %v299_v28 }
 0x141   :  { %v322_v32 = vmax.f32 %v320_v27, 0.0 }
 0x142   :  { %v321_v34 = vmax.f32 %v319_v31, 0.0 }
 0x143   :  { %v324_v36 = vadd.f32 %v322_v32, %v947_v33 }
 0x144   :  { %v323_v35 = vadd.f32 %v321_v34, %v929_v11 }
 0x146   :  { %649 = vmatprep.mubr.f32.mxu1 %v323_v35 }
 0x147   :  { %650 = vmatmul.mubr.f32.vlgmr.msra.gmra.mrb[0].mxu1 %v324_v36 }
 0x21a   :  { %v651_v37 = vpop.f32.mrb[0].mxu1 }
 0x21b   :  { %v422_v39 = vadd.f32 %v651_v37, %v545_v22  ;;  %v416_v40 = vpop.f32.mrb[1].mxu1 }
 0x21c   :  { %v417_v41 = vadd.f32 %v545_v22, %v416_v40 }
 0x21d   :  { %v432_v42 = vrot.slane %v422_v39, %v978_v9  ;;  %v442_v43 = vrot.slane %v422_v39, %v980_v10  ;;  %v454_v45 = vrot.slane %v422_v39, %v982_v12  ;;  %v466_v50 = vrot.slane %v422_v39, %v984_v14 }
 0x21e   :  { %v428_v11 = vrot.slane %v417_v41, %v978_v9  ;;  %v438_v33 = vrot.slane %v417_v41, %v980_v10  ;;  %v450_v47 = vrot.slane %v417_v41, %v982_v12  ;;  %v462_v53 = vrot.slane %v417_v41, %v984_v14 }
 0x21f   :  { %v434_v48 = vmul.f32 %v432_v42, %v955_v60  ;;  %v444_v49 = vmul.f32 %v442_v43, %v957_v61  ;;  %v456_v55 = vmul.f32 %v454_v45, %v976_v8  ;;  %v478_v9 = vrot.slane %v422_v39, %v986_v17 }
 0x220   :  { %v433_v51 = vmul.f32 %v428_v11, %v965_v1  ;;  %v443_v52 = vmul.f32 %v438_v33, %v969_v4  ;;  %v455_v12 = vmul.f32 %v450_v47, %v959_v62  ;;  %v474_v60 = vrot.slane %v417_v41, %v986_v17 }
 0x221   :  { %v446_v54 = vadd.f32 %v444_v49, %v434_v48  ;;  %v468_v61 = vmul.f32 %v466_v50, %v963_v0  ;;  %v490_v57 = vrot.slane %v422_v39, %v993_v23  ;;  %v467_v4 = vmul.f32 %v462_v53, %v961_v63 }
 0x222   :  { %v445_v10 = vadd.f32 %v443_v52, %v433_v51  ;;  %v486_v14 = vrot.slane %v417_v41, %v993_v23  ;;  %v480_v8 = vmul.f32 %v478_v9, %v967_v2  ;;  %v502_v3 = vrot.slane %v422_v39, %v1002_v30 }
 0x223   :  { %v458_v56 = vadd.f32 %v456_v55, %v446_v54  ;;  %v479_v62 = vmul.f32 %v474_v60, %v996_v25  ;;  %v498_v17 = vrot.slane %v417_v41, %v1002_v30  ;;  %v492_v0 = vmul.f32 %v490_v57, %v1018_v46 }
 0x224   :  { %v457_v1 = vadd.f32 %v455_v12, %v445_v10  ;;  %v514_v13 = vrot.slane %v422_v39, %v1015_v44  ;;  %v491_v63 = vmul.f32 %v486_v14, %v971_v6  ;;  %v510_v23 = vrot.slane %v417_v41, %v1015_v44 }
 0x225   :  { %v470_v58 = vadd.f32 %v468_v61, %v458_v56  ;;  %v504_v2 = vmul.f32 %v502_v3, %v1009_v38  ;;  %v503_v21 = vmul.f32 %v498_v17, %v988_v18 }
 0x226   :  { %v469_v5 = vadd.f32 %v467_v4, %v457_v1  ;;  %v516_v25 = vmul.f32 %v514_v13, %v1027_v59  ;;  %v515_v15 = vmul.f32 %v510_v23, %v303_v24 }
 0x227   :  { %v482_v7 = vadd.f32 %v480_v8, %v470_v58 }
 0x228   :  { %v481_v16 = vadd.f32 %v479_v62, %v469_v5 }
 0x229   :  { %v494_v19 = vadd.f32 %v492_v0, %v482_v7 }
 0x22a   :  { %v493_v20 = vadd.f32 %v491_v63, %v481_v16 }
 0x22b   :  { %v506_v26 = vadd.f32 %v504_v2, %v494_v19 }
 0x22c   :  { %v505_v30 = vadd.f32 %v503_v21, %v493_v20 }
 0x22d   :  { %v518_v27 = vadd.f32 %v516_v25, %v506_v26 }
 0x22e   :  { %v517_v46 = vadd.f32 %v515_v15, %v505_v30 }
 0x22f   :  { %v520_v28 = vmax.f32 %v518_v27, 0.0 }
 0x230   :  { %v519_v29 = vmax.f32 %v517_v46, 0.0 }
 0x231   :  { %v522_v6 = vadd.f32 %v520_v28, %v324_v36 }
 0x232   :  { %v521_v31 = vadd.f32 %v519_v29, %v323_v35 }
 0x233   :  { %524 = vst [vmem:[#allocation8 + $0x8] sm:$0xff] %v522_v6 }
 0x234   :  { %523 = vst [vmem:[#allocation8] sm:$0xff] %v521_v31 }
 0x235   :  { %821 = shalt.err (!%p818_p0)
}
 0x236   :  { %s822_s8 = scalar_lea.hbm %s1090_s4, 256 }
 0x237   :  { %p823_p1 = scmp.ne.s32.totalorder %s1090_s4, %s822_s8  ;;  %p826_p2 = scmp.lt.u32.totalorder %s822_s8, %s1090_s4 }
 0x239   :  { %p828_p3 = pnand %p826_p2, %p823_p1 }
 0x23b   :  { %831 = shalt.err (!%p828_p3)
}
 0x23c   :  { %536 = dma.vmem_to_hbm [thread:$0]  %s531_s30, 256, %s1090_s4, [#allocation4], %s840_s27, %s840_s27, %s841_s28  }
 0x23d   :  { %836 = dma.done.wait [#allocation4], 256  }
 0x23e   :  { %837 = vsyncadd [#allocation4], 4294967040 }
 0x23f   :  { %540 = vsyncpa [#allocation3], 1 }
 0x240   :  { %541 = vsyncpa [#allocation6], 1 }
 0x241   :  { %542 = vsyncpa [#allocation4], 1 }

</bundles_post_ra>
